<compile_context>
chip_gen: v7x
topology: tpu7x:2x2x1
jax: 0.10.0
libtpu: 0.0.40
codegen_flags: <defaults>
</compile_context>

<pallas_src>
import jax
import jax.numpy as jnp
from jax.experimental import pallas as pl
from jax.experimental.pallas import tpu as pltpu


def _round_up(n, m):
    return ((n + m - 1) // m) * m


def bin_multitask_kernel(x_ref, wc_ref, bias_ref, thr_ref, out_ref):
    F = wc_ref.shape[1] - 1                       # static: combined = [Wb | Wb@W]

    # Single fused MXU pass: y[:, :F] = x @ Wb,  y[:, F] = x @ (Wb @ W).
    y = jnp.dot(
        x_ref[...], wc_ref[...],
        preferred_element_type=jnp.float32,
        precision=jax.lax.Precision.HIGHEST,
    )
    bias = bias_ref[...]                          # (1, F+1) = [bb | bb @ W]

    embed = y[:, :F] + bias[:, :F]                                   # (TB, F)
    score = jnp.clip(y[:, F:F + 1] + bias[:, F:F + 1], 0.0, 1.0e6)   # (TB, 1)

    thr1 = thr_ref[:, 0:1]
    thr2 = thr_ref[:, 1:2]
    dist1 = thr1 - score
    dist2 = thr2 - score

    # logits kept as three (TB, 1) columns -> pure VPU math, no lane concat
    # until the final packed store: logit = (-dist2, min(-dist1, dist2), dist1)
    l0 = -dist2
    l1 = jnp.minimum(-dist1, dist2)
    l2 = dist1

    m = jnp.maximum(jnp.maximum(l0, l1), l2)
    e0 = jnp.exp(l0 - m)
    e1 = jnp.exp(l1 - m)
    e2 = jnp.exp(l2 - m)
    inv = pl.reciprocal(e0 + e1 + e2)             # exact; kernel is mem-bound

    # Single lane-dense packed store: [embed | score | p0 | p1 | p2]
    out_ref[...] = jnp.concatenate(
        [embed, score, e0 * inv, e1 * inv, e2 * inv], axis=1)


def make_bin_multitask_relative(wb, bb, w, *, tb_cap=512):
    """Fold parameters once; return a jitted forward(x, thr1score, thr2score)."""
    D, F = wb.shape
    hi = jax.lax.Precision.HIGHEST

    # Parameter-only folding: done ONCE here, not per forward call.
    wbw = jnp.matmul(wb, w, precision=hi)                               # (D, 1)
    w_comb = jnp.concatenate([wb, wbw], axis=1)                         # (D, F+1)
    bias_comb = jnp.concatenate(
        [bb.reshape(1, F), jnp.matmul(bb.reshape(1, F), w, precision=hi)],
        axis=1)                                                         # (1, F+1)
    w_comb, bias_comb = jax.block_until_ready((w_comb, bias_comb))

    @jax.jit
    def forward(x, thr1score, thr2score):
        B = x.shape[0]
        x_flat = x.reshape(B, -1)                                       # (B, D)
        thr = jnp.concatenate([thr1score, thr2score], axis=1)           # (B, 2)

        # 8-aligned batch tile (never the TB=B fallback); pad B so TB | B_pad.
        TB = min(tb_cap, _round_up(B, 8))
        B_pad = _round_up(B, TB)
        if B_pad != B:
            x_flat = jnp.pad(x_flat, ((0, B_pad - B), (0, 0)))
            thr = jnp.pad(thr, ((0, B_pad - B), (0, 0)))
        grid = (B_pad // TB,)

        packed = pl.pallas_call(
            bin_multitask_kernel,
            out_shape=jax.ShapeDtypeStruct((B_pad, F + 4), jnp.float32),
            grid=grid,
            in_specs=[
                pl.BlockSpec((TB, D), lambda i: (i, 0)),        # x (batch-tiled)
                pl.BlockSpec((D, F + 1), lambda i: (0, 0)),     # [Wb | Wb@W]
                pl.BlockSpec((1, F + 1), lambda i: (0, 0)),     # [bb | bb@W]
                pl.BlockSpec((TB, 2), lambda i: (i, 0)),        # [thr1 | thr2]
            ],
            out_specs=pl.BlockSpec((TB, F + 4), lambda i: (i, 0)),
            compiler_params=pltpu.CompilerParams(
                dimension_semantics=("parallel",)),
        )(x_flat, w_comb, bias_comb, thr)

        embed = packed[:B, :F]
        score = packed[:B, F:F + 1]
        probs = packed[:B, F + 1:F + 4]
        return embed, score, probs

    return forward


if __name__ == "__main__":
    # Small shapes consistent with the module's forward.
    B, C, H, W_sp = 2, 4, 16, 16
    feature_size = 32
    D = C * H * W_sp

    key = jax.random.PRNGKey(0)
    kx, kwb, kbb, kw, kt1, kt2 = jax.random.split(key, 6)

    x = jax.random.normal(kx, (B, C, H, W_sp), dtype=jnp.float32)

    # Deterministic parameter init (synthetic backbone: flatten + linear).
    wb = jax.random.normal(kwb, (D, feature_size), dtype=jnp.float32) * 0.02
    bb = jax.random.normal(kbb, (feature_size,), dtype=jnp.float32) * 0.02
    # nn.init.normal_(self.W): standard normal, shape (feature_size, 1)
    w = jax.random.normal(kw, (feature_size, 1), dtype=jnp.float32)

    thr1score = jax.random.normal(kt1, (B, 1), dtype=jnp.float32)
    thr2score = jax.random.normal(kt2, (B, 1), dtype=jnp.float32)

    forward = make_bin_multitask_relative(wb, bb, w)
    embed, score, probs = forward(x, thr1score, thr2score)
    jax.block_until_ready((embed, score, probs))

    # Reference in plain JAX (high-precision matmuls) for sanity.
    hi = jax.lax.Precision.HIGHEST
    embed_ref = jnp.matmul(x.reshape(B, D), wb, precision=hi) + bb
    score_ref = jnp.clip(jnp.matmul(embed_ref, w, precision=hi), 0.0, 1.0e6)
    d1 = thr1score - score_ref
    d2 = thr2score - score_ref
    logit_ref = jnp.concatenate([-d2, jnp.minimum(-d1, d2), d1], axis=1)
    probs_ref = jax.nn.softmax(logit_ref, axis=1)

    assert embed.shape == (B, feature_size)
    assert score.shape == (B, 1)
    assert probs.shape == (B, 3)
    assert jnp.allclose(embed, embed_ref, atol=1e-4)
    # Fused x@(Wb@W) changes fp summation order vs (x@Wb)@W in the reference.
    assert jnp.allclose(score, score_ref, atol=1e-3)
    assert jnp.allclose(probs, probs_ref, atol=1e-3)
    assert jnp.allclose(jnp.sum(probs, axis=1), 1.0, atol=1e-5)

    print("KERNEL_OK")
</pallas_src>

<mosaic_0001>
module attributes {stable_mosaic.version = 11 : i64} {
  func.func @bin_multitask_kernel(%arg0: i32, %arg1: memref<8x1024xf32, #tpu.memory_space<vmem>>, %arg2: memref<1024x33xf32, #tpu.memory_space<vmem>>, %arg3: memref<1x33xf32, #tpu.memory_space<vmem>>, %arg4: memref<8x2xf32, #tpu.memory_space<vmem>>, %arg5: memref<8x36xf32, #tpu.memory_space<vmem>>) attributes {dimension_semantics = [#tpu.dimension_semantics<parallel>], iteration_bounds = array<i64: 1>, scalar_prefetch = 0 : i64, scratch_operands = 0 : i64, tpu.core_type = #tpu.core_type<tc>, window_params = [{transform_indices = @transform_0, window_bounds = array<i64: 8, 1024>}, {pipeline_mode = #tpu.pipeline_mode<synchronous>, transform_indices = @transform_1, window_bounds = array<i64: 1024, 33>}, {pipeline_mode = #tpu.pipeline_mode<synchronous>, transform_indices = @transform_2, window_bounds = array<i64: 1, 33>}, {transform_indices = @transform_3, window_bounds = array<i64: 8, 2>}, {transform_indices = @transform_4, window_bounds = array<i64: 8, 36>}]} {
    %c0 = arith.constant 0 : index
    %c0_0 = arith.constant 0 : index
    %0 = vector.load %arg1[%c0, %c0_0] : memref<8x1024xf32, #tpu.memory_space<vmem>>, vector<8x1024xf32>
    %c0_1 = arith.constant 0 : index
    %c0_2 = arith.constant 0 : index
    %1 = vector.load %arg2[%c0_1, %c0_2] : memref<1024x33xf32, #tpu.memory_space<vmem>>, vector<1024x33xf32>
    %cst = arith.constant dense<0.000000e+00> : vector<8x33xf32>
    %2 = tpu.matmul %0, %1, %cst {dimension_numbers = #tpu.dot_dimension_numbers<[1], [0], [0], [1], [0, 0, 1, 1], [], []>, precision = #tpu.contract_precision<fp32>} : vector<8x1024xf32>, vector<1024x33xf32>, vector<8x33xf32> -> vector<8x33xf32>
    %c0_3 = arith.constant 0 : index
    %c0_4 = arith.constant 0 : index
    %3 = vector.load %arg3[%c0_3, %c0_4] : memref<1x33xf32, #tpu.memory_space<vmem>>, vector<1x33xf32>
    %4 = vector.extract_strided_slice %2 {offsets = [0, 0], sizes = [8, 32], strides = [1, 1]} : vector<8x33xf32> to vector<8x32xf32>
    %5 = vector.extract_strided_slice %3 {offsets = [0, 0], sizes = [1, 32], strides = [1, 1]} : vector<1x33xf32> to vector<1x32xf32>
    %6 = vector.broadcast %5 : vector<1x32xf32> to vector<8x32xf32>
    %7 = arith.addf %4, %6 : vector<8x32xf32>
    %8 = vector.extract_strided_slice %2 {offsets = [0, 32], sizes = [8, 1], strides = [1, 1]} : vector<8x33xf32> to vector<8x1xf32>
    %9 = vector.extract_strided_slice %3 {offsets = [0, 32], sizes = [1, 1], strides = [1, 1]} : vector<1x33xf32> to vector<1x1xf32>
    %10 = vector.broadcast %9 : vector<1x1xf32> to vector<8x1xf32>
    %11 = arith.addf %8, %10 : vector<8x1xf32>
    %cst_5 = arith.constant 0.000000e+00 : f32
    %cst_6 = arith.constant 1.000000e+06 : f32
    %12 = vector.broadcast %cst_5 : f32 to vector<8x1xf32>
    %13 = arith.maximumf %12, %11 : vector<8x1xf32>
    %14 = vector.broadcast %cst_6 : f32 to vector<8x1xf32>
    %15 = arith.minimumf %14, %13 : vector<8x1xf32>
    %c0_7 = arith.constant 0 : index
    %c0_8 = arith.constant 0 : index
    %16 = vector.load %arg4[%c0_7, %c0_8] : memref<8x2xf32, #tpu.memory_space<vmem>>, vector<8x1xf32>
    %c0_9 = arith.constant 0 : index
    %c1 = arith.constant 1 : index
    %17 = vector.load %arg4[%c0_9, %c1] : memref<8x2xf32, #tpu.memory_space<vmem>>, vector<8x1xf32>
    %18 = arith.subf %16, %15 : vector<8x1xf32>
    %19 = arith.subf %17, %15 : vector<8x1xf32>
    %cst_10 = arith.constant 0.000000e+00 : f32
    %20 = vector.broadcast %cst_10 : f32 to vector<8x1xf32>
    %21 = arith.subf %20, %19 : vector<8x1xf32>
    %cst_11 = arith.constant 0.000000e+00 : f32
    %22 = vector.broadcast %cst_11 : f32 to vector<8x1xf32>
    %23 = arith.subf %22, %18 : vector<8x1xf32>
    %24 = arith.minimumf %23, %19 : vector<8x1xf32>
    %25 = arith.maximumf %21, %24 : vector<8x1xf32>
    %26 = arith.maximumf %25, %18 : vector<8x1xf32>
    %27 = arith.subf %21, %26 : vector<8x1xf32>
    %28 = math.exp %27 : vector<8x1xf32>
    %29 = arith.subf %24, %26 : vector<8x1xf32>
    %30 = math.exp %29 : vector<8x1xf32>
    %31 = arith.subf %18, %26 : vector<8x1xf32>
    %32 = math.exp %31 : vector<8x1xf32>
    %33 = arith.addf %28, %30 : vector<8x1xf32>
    %34 = arith.addf %33, %32 : vector<8x1xf32>
    %35 = tpu.reciprocal %34 : vector<8x1xf32> -> vector<8x1xf32>
    %36 = arith.mulf %28, %35 : vector<8x1xf32>
    %37 = arith.mulf %30, %35 : vector<8x1xf32>
    %38 = arith.mulf %32, %35 : vector<8x1xf32>
    %39 = tpu.concatenate %7, %15, %36, %37, %38 in 1 : vector<8x32xf32>, vector<8x1xf32>, vector<8x1xf32>, vector<8x1xf32>, vector<8x1xf32> -> vector<8x36xf32>
    %c0_12 = arith.constant 0 : index
    %c0_13 = arith.constant 0 : index
    %40 = vector.load %arg5[%c0_12, %c0_13] : memref<8x36xf32, #tpu.memory_space<vmem>>, vector<8x36xf32>
    tpu.vector_store %arg5[%c0_12, %c0_13], %39 {strides = array<i32>} : memref<8x36xf32, #tpu.memory_space<vmem>>, vector<8x36xf32>,
    return
  }
  func.func @transform_0(%arg0: i32) -> (i32, i32) {
    %c0_i32 = arith.constant 0 : i32
    %c0_i32_0 = arith.constant 0 : i32
    return %arg0, %c0_i32 : i32, i32
  }
  func.func @transform_1(%arg0: i32) -> (i32, i32) {
    %c0_i32 = arith.constant 0 : i32
    %c0_i32_0 = arith.constant 0 : i32
    %c0_i32_1 = arith.constant 0 : i32
    return %c0_i32, %c0_i32_0 : i32, i32
  }
  func.func @transform_2(%arg0: i32) -> (i32, i32) {
    %c0_i32 = arith.constant 0 : i32
    %c0_i32_0 = arith.constant 0 : i32
    %c0_i32_1 = arith.constant 0 : i32
    return %c0_i32, %c0_i32_0 : i32, i32
  }
  func.func @transform_3(%arg0: i32) -> (i32, i32) {
    %c0_i32 = arith.constant 0 : i32
    %c0_i32_0 = arith.constant 0 : i32
    return %arg0, %c0_i32 : i32, i32
  }
  func.func @transform_4(%arg0: i32) -> (i32, i32) {
    %c0_i32 = arith.constant 0 : i32
    %c0_i32_0 = arith.constant 0 : i32
    return %arg0, %c0_i32 : i32, i32
  }
}

</mosaic_0001>

<bundles_post_ra>
// kernel: forward.1
= control target key start
LH: loop header
LB: loop body
LE: loop exit
PB: predicated region body
PF: predicated region fallthrough
CT: control target
= control target key end

     0   :  { %9 = vsyncpa [#allocation3], 0  ;;  %s5361_s15 = smov [#allocation2]   ;;  %s7268_s0 = inlined_call_operand.vmem [shape: f32[8,1024], index: 0, kind: input, shape index: {}]   ;;  %s7269_s1 = inlined_call_operand.hbm [shape: f32[1024,33], index: 1, kind: input, shape index: {}]   ;;  %s7270_s2 = inlined_call_operand.vmem [shape: f32[1,33], index: 2, kind: input, shape index: {}]   ;;  %s7271_s3 = inlined_call_operand.vmem [shape: f32[8,2], index: 3, kind: input, shape index: {}]   ;;  %s7272_s4 = inlined_call_operand.vmem [shape: f32[8,36], index: 4, kind: output, shape index: {}]  }
   0x1   :  { %s17_s16 = sshll.u32 %s5361_s15, 4  ;;  %s5337_s19 = scalar_lea.hbm %s7269_s1, 16384  ;;  %s18_s16 = int_to_ptr.vmem [resolvable:$true] %s17_s16 }
   0x2   :  { %p5338_p0 = scmp.ne.s32.totalorder %s7269_s1, %s5337_s19  ;;  %p5341_p1 = scmp.lt.u32.totalorder %s5337_s19, %s7269_s1 }
   0x4   :  { %p5343_p2 = pnand %p5341_p1, %p5338_p0 }
   0x6   :  { %5346 = shalt.err (!%p5343_p2)
}
   0x7   :  { %s5347_s24 = scalar_lea.vmem %s18_s16, 16384  ;;  %p5352_p4 = scmp.lt.s32.totalorder %s18_s16, %s18_s16 }
   0x8   :  { %p5348_p3 = scmp.ne.s32.totalorder %s18_s16, %s5347_s24  ;;  %p5353_p5 = scmp.lt.s32.totalorder %s5347_s24, %s5347_s24 }
   0xa   :  { %p5354_p6 = por %p5353_p5, %p5352_p4 }
   0xc   :  { %p5355_p7 = pnand %p5354_p6, %p5348_p3 }
   0xe   :  { %5358 = shalt.err (!%p5355_p7)
}
   0xf   :  { %s5362_s25 = smov 128   ;;  %s5363_s26 = smov 8  }
  0x10   :  { %23 = dma.hbm_to_vmem [thread:$0]  %s7269_s1, 16384, %s18_s16, [#allocation3], %s5362_s25, %s5362_s25, %s5363_s26  }
  0x11   :  { %5359 = dma.done.wait [#allocation3], 16384  }
  0x12   :  { %5360 = vsyncadd [#allocation3], 4294950912  ;;  %v55_v0 = vld [vmem:[#allocation2 + $0x80] sm:$0xff]  ;;  %v56_v1 = vld [vmem:[#allocation2 + $0x88] sm:$0xff]  ;;  %vm3695_vm0 = vcmask 261120   ;;  %s5364_s19 = smov 97  }
  0x13   :  { %v39_v2 = vld [vmem:[#allocation2] sm:$0xff]  ;;  %v216_v3 = vand.u32 4294901760, %v55_v0  ;;  %v219_v4 = vand.u32 4294901760, %v56_v1  ;;  %v40_v5 = vld [vmem:[#allocation2 + $0x8] sm:$0xff]  ;;  %v57_v7 = vld [vmem:[#allocation2 + $0x90] sm:$0xff]  ;;  %s5365_s20 = smov 96  }
  0x14   :  { %v168_v6 = vand.u32 4294901760, %v39_v2  ;;  %v58_v8 = vld [vmem:[#allocation2 + $0x98] sm:$0xff]  ;;  %v171_v9 = vand.u32 4294901760, %v40_v5  ;;  %v222_v10 = vand.u32 4294901760, %v57_v7  ;;  %v41_v12 = vld [vmem:[#allocation2 + $0x10] sm:$0xff]  ;;  %v59_v18 = vld [vmem:[#allocation2 + $0xa0] sm:$0xff] }
  0x15   :  { %v225_v11 = vand.u32 4294901760, %v58_v8  ;;  %v42_v13 = vld [vmem:[#allocation2 + $0x18] sm:$0xff]  ;;  %v5408_v14 = vpack.c.bf16 %v219_v4, %v216_v3  ;;  %v174_v16 = vand.u32 4294901760, %v41_v12  ;;  %v60_v19 = vld [vmem:[#allocation2 + $0xa8] sm:$0xff]  ;;  %v43_v23 = vld [vmem:[#allocation2 + $0x20] sm:$0xff]  ;;  %v228_v29 = vand.u32 4294901760, %v59_v18 }
  0x16   :  { %v5410_v15 = vsub.f32 %v39_v2, %v168_v6  ;;  %v177_v17 = vand.u32 4294901760, %v42_v13  ;;  %v5412_v20 = vpack.c.bf16 %v171_v9, %v168_v6  ;;  %v5414_v21 = vsub.f32 %v40_v5, %v171_v9  ;;  %v44_v24 = vld [vmem:[#allocation2 + $0x28] sm:$0xff]  ;;  %v61_v37 = vld [vmem:[#allocation2 + $0xb0] sm:$0xff]  ;;  %v62_v42 = vld [vmem:[#allocation2 + $0xb8] sm:$0xff]  ;;  %s5366_s23 = smov 127   ;;  %s5369_s24 = smov 34  }
  0x17   :  { %v5416_v22 = vpack.c.bf16 %v225_v11, %v222_v10  ;;  %4552 = vmatprep.subr.bf16.mxu0 %v5408_v14  ;;  %v5419_v25 = vsub.f32 %v57_v7, %v222_v10  ;;  %v5421_v26 = vsub.f32 %v58_v8, %v225_v11  ;;  %v5425_v28 = vsub.f32 %v41_v12, %v174_v16  ;;  %v45_v55 = vld [vmem:[#allocation2 + $0x30] sm:$0xff]  ;;  %v46_v56 = vld [vmem:[#allocation2 + $0x38] sm:$0xff]  ;;  %v63_v5 = vld [vmem:[#allocation2 + $0xc0] sm:$0xff]  ;;  %s5370_s25 = smov 35  }
  0x18   :  { %v5423_v27 = vpack.c.bf16 %v177_v17, %v174_v16  ;;  %4554 = vmatpush3.bf16.msra.mxu0 %v5412_v20  ;;  %v231_v30 = vand.u32 4294901760, %v60_v19  ;;  %v5428_v31 = vsub.f32 %v55_v0, %v216_v3  ;;  %v5430_v32 = vsub.f32 %v56_v1, %v219_v4  ;;  %v64_v6 = vld [vmem:[#allocation2 + $0xc8] sm:$0xff]  ;;  %v47_v11 = vld [vmem:[#allocation2 + $0x40] sm:$0xff] }
  0x19   :  { %4556 = vmatprep.subr.bf16.mxu0 %v5416_v22  ;;  %v180_v33 = vand.u32 4294901760, %v43_v23  ;;  %v183_v34 = vand.u32 4294901760, %v44_v24  ;;  %v7288_v35 = vand.u32 4294901760, %v5410_v15  ;;  %v7287_v36 = vand.u32 4294901760, %v5414_v21 }
  0x1a   :  { %v5435_v38 = vsub.f32 %v42_v13, %v177_v17  ;;  %v5437_v39 = vpack.c.bf16 %v231_v30, %v228_v29  ;;  %v5439_v40 = vsub.f32 %v59_v18, %v228_v29  ;;  %v7294_v41 = vand.u32 4294901760, %v5428_v31  ;;  %v48_v29 = vld [vmem:[#allocation2 + $0x48] sm:$0xff] }
  0x1b   :  { %v5442_v43 = vsub.f32 %v60_v19, %v231_v30  ;;  %v7290_v44 = vand.u32 4294901760, %v5430_v32  ;;  %v5445_v45 = vpack.c.bf16 %v183_v34, %v180_v33  ;;  %v5447_v46 = vsub.f32 %v43_v23, %v180_v33 }
  0x1c   :  { %4558 = vmatpush3.bf16.msra.mxu0 %v5423_v27  ;;  %v395_v47 = vsub.f32 %v5428_v31, %v7294_v41  ;;  %v283_v48 = vsub.f32 %v5410_v15, %v7288_v35  ;;  %v290_v49 = vsub.f32 %v5414_v21, %v7287_v36  ;;  %v234_v50 = vand.u32 4294901760, %v61_v37 }
  0x1d   :  { %4560 = vmatprep.subr.bf16.mxu0 %v5437_v39  ;;  %v402_v51 = vsub.f32 %v5430_v32, %v7290_v44  ;;  %v237_v52 = vand.u32 4294901760, %v62_v42  ;;  %v7285_v53 = vand.u32 4294901760, %v5419_v25  ;;  %v7283_v54 = vand.u32 4294901760, %v5421_v26 }
  0x1e   :  { %v396_v57 = vand.u32 4294901760, %v395_v47  ;;  %v5465_v58 = vsub.f32 %v44_v24, %v183_v34  ;;  %v284_v59 = vand.u32 4294901760, %v283_v48  ;;  %v291_v60 = vand.u32 4294901760, %v290_v49 }
  0x1f   :  { %v403_v61 = vand.u32 4294901760, %v402_v51  ;;  %v5467_v62 = vpack.c.bf16 %v237_v52, %v234_v50  ;;  %v5469_v63 = vsub.f32 %v61_v37, %v234_v50  ;;  %v409_v0 = vsub.f32 %v5419_v25, %v7285_v53 }
  0x20   :  { %4562 = vmatpush3.bf16.msra.mxu0 %v5445_v45  ;;  %v4585_v1 = vpack.c.bf16 %v291_v60, %v284_v59  ;;  %v416_v2 = vsub.f32 %v5421_v26, %v7283_v54  ;;  %v186_v3 = vand.u32 4294901760, %v45_v55  ;;  %v189_v4 = vand.u32 4294901760, %v46_v56  ;;  %v66_v59 = vld [vmem:[#allocation2 + $0xd8] sm:$0xff] }
  0x21   :  { %v4583_v7 = vpack.c.bf16 %v403_v61, %v396_v57  ;;  %4564 = vmatprep.subr.bf16.mxu0 %v5467_v62  ;;  %v410_v8 = vand.u32 4294901760, %v409_v0  ;;  %v7282_v9 = vand.u32 4294901760, %v5425_v28  ;;  %v7280_v10 = vand.u32 4294901760, %v5435_v38  ;;  %v65_v57 = vld [vmem:[#allocation2 + $0xd0] sm:$0xff]  ;;  %v70_v54 = vld [vmem:[#allocation2 + $0xf8] sm:$0xff] }
  0x22   :  { %v5481_v12 = vsub.f32 %v62_v42, %v237_v52  ;;  %v417_v13 = vand.u32 4294901760, %v416_v2  ;;  %v5483_v16 = vpack.c.bf16 %v189_v4, %v186_v3  ;;  %v5485_v17 = vsub.f32 %v45_v55, %v186_v3 }
  0x23   :  { %4584 = vmatprep.subr.bf16.mxu1 %v4583_v7  ;;  %v297_v18 = vsub.f32 %v5425_v28, %v7282_v9  ;;  %v304_v19 = vsub.f32 %v5435_v38, %v7280_v10  ;;  %v240_v23 = vand.u32 4294901760, %v63_v5  ;;  %v243_v24 = vand.u32 4294901760, %v64_v6  ;;  %v69_v9 = vld [vmem:[#allocation2 + $0xf0] sm:$0xff] }
  0x24   :  { %4586 = vmatpush3.bf16.msra.mxu1 %v4585_v1  ;;  %v4587_v30 = vpack.c.bf16 %v417_v13, %v410_v8  ;;  %4566 = vmatpush3.bf16.msra.mxu0 %v5483_v16  ;;  %v7278_v33 = vand.u32 4294901760, %v5439_v40  ;;  %v7277_v34 = vand.u32 4294901760, %v5442_v43  ;;  %v192_v37 = vand.u32 4294901760, %v47_v11  ;;  %v49_v1 = vld [vmem:[#allocation2 + $0x50] sm:$0xff] }
  0x25   :  { %v5496_v42 = vsub.f32 %v46_v56, %v189_v4  ;;  %v298_v47 = vand.u32 4294901760, %v297_v18  ;;  %v305_v48 = vand.u32 4294901760, %v304_v19  ;;  %v5498_v49 = vpack.c.bf16 %v243_v24, %v240_v23  ;;  %v50_v18 = vld [vmem:[#allocation2 + $0x58] sm:$0xff] }
  0x26   :  { %4588 = vmatprep.subr.bf16.mxu1 %v4587_v30  ;;  %v5500_v50 = vsub.f32 %v63_v5, %v240_v23  ;;  %v423_v51 = vsub.f32 %v5439_v40, %v7278_v33  ;;  %v430_v52 = vsub.f32 %v5442_v43, %v7277_v34  ;;  %v195_v55 = vand.u32 4294901760, %v48_v29 }
  0x27   :  { %v4589_v56 = vpack.c.bf16 %v305_v48, %v298_v47  ;;  %4568 = vmatprep.subr.bf16.mxu0 %v5498_v49  ;;  %v5509_v60 = vsub.f32 %v64_v6, %v243_v24  ;;  %v7275_v61 = vand.u32 4294901760, %v5447_v46  ;;  %v7273_v0 = vand.u32 4294901760, %v5465_v58 }
  0x28   :  { %v424_v2 = vand.u32 4294901760, %v423_v51  ;;  %v431_v3 = vand.u32 4294901760, %v430_v52  ;;  %v5513_v4 = vpack.c.bf16 %v195_v55, %v192_v37  ;;  %v5515_v5 = vsub.f32 %v47_v11, %v192_v37 }
  0x29   :  { %4590 = vmatpush3.bf16.msra.mxu1 %v4589_v56  ;;  %v311_v7 = vsub.f32 %v5447_v46, %v7275_v61  ;;  %v318_v6 = vsub.f32 %v5465_v58, %v7273_v0  ;;  %v246_v8 = vand.u32 4294901760, %v65_v57  ;;  %v249_v13 = vand.u32 4294901760, %v66_v59  ;;  %v68_v0 = vld [vmem:[#allocation2 + $0xe8] sm:$0xff] }
  0x2a   :  { %v4591_v19 = vpack.c.bf16 %v431_v3, %v424_v2  ;;  %4570 = vmatpush3.bf16.msra.mxu0 %v5513_v4  ;;  %v7274_v23 = vand.u32 4294901760, %v5469_v63  ;;  %v7276_v11 = vand.u32 4294901760, %v5481_v12  ;;  %v198_v24 = vand.u32 4294901760, %v49_v1  ;;  %v67_v3 = vld [vmem:[#allocation2 + $0xe0] sm:$0xff] }
  0x2b   :  { %v5526_v30 = vsub.f32 %v48_v29, %v195_v55  ;;  %v312_v37 = vand.u32 4294901760, %v311_v7  ;;  %v319_v47 = vand.u32 4294901760, %v318_v6  ;;  %v5528_v48 = vpack.c.bf16 %v249_v13, %v246_v8  ;;  %v51_v6 = vld [vmem:[#allocation2 + $0x60] sm:$0xff] }
  0x2c   :  { %4592 = vmatprep.subr.bf16.mxu1 %v4591_v19  ;;  %v5530_v51 = vsub.f32 %v65_v57, %v246_v8  ;;  %v437_v52 = vsub.f32 %v5469_v63, %v7274_v23  ;;  %v444_v56 = vsub.f32 %v5481_v12, %v7276_v11  ;;  %v201_v2 = vand.u32 4294901760, %v50_v18  ;;  %v52_v11 = vld [vmem:[#allocation2 + $0x68] sm:$0xff] }
  0x2d   :  { %v4593_v29 = vpack.c.bf16 %v319_v47, %v312_v37  ;;  %4572 = vmatprep.subr.bf16.mxu0 %v5528_v48  ;;  %v5539_v55 = vsub.f32 %v66_v59, %v249_v13  ;;  %v7279_v7 = vand.u32 4294901760, %v5485_v17  ;;  %v7281_v57 = vand.u32 4294901760, %v5496_v42 }
  0x2e   :  { %v438_v8 = vand.u32 4294901760, %v437_v52  ;;  %v445_v19 = vand.u32 4294901760, %v444_v56  ;;  %v5543_v23 = vpack.c.bf16 %v201_v2, %v198_v24  ;;  %v5545_v61 = vsub.f32 %v49_v1, %v198_v24 }
  0x2f   :  { %4594 = vmatpush3.bf16.msra.mxu1 %v4593_v29  ;;  %v325_v37 = vsub.f32 %v5485_v17, %v7279_v7  ;;  %v332_v59 = vsub.f32 %v5496_v42, %v7281_v57  ;;  %v252_v13 = vand.u32 4294901760, %v67_v3  ;;  %v255_v47 = vand.u32 4294901760, %v68_v0 }
  0x30   :  { %7463 = vst [vmem:[#allocation5_spill] sm:$0xff] %v5543_v23  ;;  %v4595_v34 = vpack.c.bf16 %v445_v19, %v438_v8  ;;  %4574 = vmatpush3.bf16.msra.mxu0 %v5543_v23  ;;  %v7284_v52 = vand.u32 4294901760, %v5500_v50  ;;  %v7286_v1 = vand.u32 4294901760, %v5509_v60  ;;  %v204_v24 = vand.u32 4294901760, %v51_v6 }
  0x31   :  { %v5556_v56 = vsub.f32 %v50_v18, %v201_v2  ;;  %v326_v29 = vand.u32 4294901760, %v325_v37  ;;  %v333_v33 = vand.u32 4294901760, %v332_v59  ;;  %v5558_v7 = vpack.c.bf16 %v255_v47, %v252_v13  ;;  %v53_v37 = vld [vmem:[#allocation2 + $0x70] sm:$0xff] }
  0x32   :  { %4596 = vmatprep.subr.bf16.mxu1 %v4595_v34  ;;  %v5560_v10 = vsub.f32 %v67_v3, %v252_v13  ;;  %v451_v8 = vsub.f32 %v5500_v50, %v7284_v52  ;;  %v458_v19 = vsub.f32 %v5509_v60, %v7286_v1  ;;  %v207_v57 = vand.u32 4294901760, %v52_v11  ;;  %v54_v1 = vld [vmem:[#allocation2 + $0x78] sm:$0xff] }
  0x33   :  { %7464 = vst [vmem:[#allocation6_spill] sm:$0xff] %v5558_v7  ;;  %v4597_v18 = vpack.c.bf16 %v333_v33, %v326_v29  ;;  %4576 = vmatprep.subr.bf16.mxu0 %v5558_v7  ;;  %v5569_v2 = vsub.f32 %v68_v0, %v255_v47  ;;  %v7289_v34 = vand.u32 4294901760, %v5515_v5  ;;  %v7291_v3 = vand.u32 4294901760, %v5526_v30 }
  0x34   :  { %v452_v59 = vand.u32 4294901760, %v451_v8  ;;  %v459_v13 = vand.u32 4294901760, %v458_v19  ;;  %v5573_v52 = vpack.c.bf16 %v207_v57, %v204_v24  ;;  %v5575_v53 = vsub.f32 %v51_v6, %v204_v24 }
  0x35   :  { %4598 = vmatpush3.bf16.msra.mxu1 %v4597_v18  ;;  %v339_v33 = vsub.f32 %v5515_v5, %v7289_v34  ;;  %v346_v0 = vsub.f32 %v5526_v30, %v7291_v3  ;;  %v258_v47 = vand.u32 4294901760, %v69_v9  ;;  %v261_v29 = vand.u32 4294901760, %v70_v54 }
  0x36   :  { %7465 = vst [vmem:[#allocation7_spill] sm:$0xff] %v5573_v52  ;;  %v4599_v36 = vpack.c.bf16 %v459_v13, %v452_v59  ;;  %4578 = vmatpush3.bf16.msra.mxu0 %v5573_v52  ;;  %v7293_v8 = vand.u32 4294901760, %v5530_v51  ;;  %v7292_v6 = vand.u32 4294901760, %v5539_v55  ;;  %v210_v24 = vand.u32 4294901760, %v53_v37 }
  0x37   :  { %v5586_v19 = vsub.f32 %v52_v11, %v207_v57  ;;  %v340_v18 = vand.u32 4294901760, %v339_v33  ;;  %v347_v35 = vand.u32 4294901760, %v346_v0  ;;  %v5588_v34 = vpack.c.bf16 %v261_v29, %v258_v47  ;;  %v32_v11 = vld [vmem:[%s7268_s0 + $0x8] sm:$0xff]  ;;  %v31_v0 = vld [vmem:[%s7268_s0] sm:$0xff] }
  0x38   :  { %4600 = vmatprep.subr.bf16.mxu1 %v4599_v36  ;;  %v5590_v44 = vsub.f32 %v69_v9, %v258_v47  ;;  %v465_v59 = vsub.f32 %v5530_v51, %v7293_v8  ;;  %v472_v13 = vsub.f32 %v5539_v55, %v7292_v6  ;;  %v213_v3 = vand.u32 4294901760, %v54_v1 }
  0x39   :  { %7466 = vst [vmem:[#allocation8_spill] sm:$0xff] %v5588_v34  ;;  %v4601_v57 = vpack.c.bf16 %v347_v35, %v340_v18  ;;  %4580 = vmatprep.subr.bf16.mxu0 %v5588_v34  ;;  %v5602_v33 = vsub.f32 %v70_v54, %v261_v29  ;;  %v7297_v36 = vand.u32 4294901760, %v5545_v61  ;;  %v7298_v9 = vand.u32 4294901760, %v5556_v56 }
  0x3a   :  { %v466_v47 = vand.u32 4294901760, %v465_v59  ;;  %v473_v6 = vand.u32 4294901760, %v472_v13  ;;  %v5609_v8 = vpack.c.bf16 %v213_v3, %v210_v24  ;;  %v5611_v41 = vsub.f32 %v53_v37, %v210_v24 }
  0x3b   :  { %4602 = vmatpush3.bf16.msra.mxu1 %v4601_v57  ;;  %v353_v35 = vsub.f32 %v5545_v61, %v7297_v36  ;;  %v360_v54 = vsub.f32 %v5556_v56, %v7298_v9  ;;  %v5619_v29 = vand.u32 4294901760, %v32_v11  ;;  %v7301_v18 = vand.u32 4294901760, %v5560_v10 }
  0x3c   :  { %7467 = vst [vmem:[#allocation9_spill] sm:$0xff] %v5609_v8  ;;  %v4603_v34 = vpack.c.bf16 %v473_v6, %v466_v47  ;;  %4582 = vmatpush3.bf16.msra.mxu0 %v5609_v8  ;;  %v7307_v59 = vand.u32 4294901760, %v5569_v2  ;;  %v4615_v37 = vpack.c.bf16 %v5430_v32, %v5428_v31  ;;  %v5626_v24 = vand.u32 4294901760, %v31_v0 }
  0x3d   :  { %7468 = vst [vmem:[#allocation10_spill] sm:$0xff] %v5619_v29  ;;  %v354_v13 = vand.u32 4294901760, %v353_v35  ;;  %v361_v57 = vand.u32 4294901760, %v360_v54  ;;  %v5629_v36 = vsub.f32 %v32_v11, %v5619_v29  ;;  %v479_v9 = vsub.f32 %v5560_v10, %v7301_v18  ;;  %504 = vmatprep.mubr.f32.mxu1 %v5619_v29 }
  0x3e   :  { %4604 = vmatprep.subr.bf16.mxu1 %v4603_v34  ;;  %v486_v6 = vsub.f32 %v5569_v2, %v7307_v59  ;;  %4616 = vmatprep.subr.bf16.mxu0 %v4615_v37  ;;  %v5639_v47 = vsub.f32 %v31_v0, %v5626_v24  ;;  %v7306_v35 = vand.u32 4294901760, %v5575_v53  ;;  %v7308_v11 = vand.u32 4294901760, %v5586_v19 }
  0x3f   :  { %v5643_v54 = vsub.f32 %v54_v1, %v213_v3  ;;  %v4605_v8 = vpack.c.bf16 %v361_v57, %v354_v13  ;;  %v7309_v18 = vand.u32 4294901760, %v5629_v36  ;;  %v480_v52 = vand.u32 4294901760, %v479_v9 }
  0x40   :  { %v487_v29 = vand.u32 4294901760, %v486_v6  ;;  %v271_v34 = vand.u32 4294901760, %v5639_v47  ;;  %v367_v37 = vsub.f32 %v5575_v53, %v7306_v35  ;;  %v374_v0 = vsub.f32 %v5586_v19, %v7308_v11 }
  0x41   :  { %4606 = vmatpush3.bf16.msra.mxu1 %v4605_v8  ;;  %v266_v1 = vsub.f32 %v5629_v36, %v7309_v18  ;;  %v4617_v3 = vpack.c.bf16 %v5414_v21, %v5410_v15  ;;  %v7314_v9 = vand.u32 4294901760, %v5590_v44  ;;  %v7317_v13 = vand.u32 4294901760, %v5602_v33 }
  0x42   :  { %v4607_v57 = vpack.c.bf16 %v487_v29, %v480_v52  ;;  %v272_v6 = vsub.f32 %v5639_v47, %v271_v34  ;;  %v368_v35 = vand.u32 4294901760, %v367_v37  ;;  %v375_v59 = vand.u32 4294901760, %v374_v0 }
  0x43   :  { %v267_v11 = vand.u32 4294901760, %v266_v1  ;;  %v493_v8 = vsub.f32 %v5590_v44, %v7314_v9  ;;  %v500_v18 = vsub.f32 %v5602_v33, %v7317_v13  ;;  %v7316_v7 = vand.u32 4294901760, %v5611_v41 }
  0x44   :  { %4608 = vmatprep.subr.bf16.mxu1 %v4607_v57  ;;  %v273_v23 = vand.u32 4294901760, %v272_v6  ;;  %v4609_v52 = vpack.c.bf16 %v375_v59, %v368_v35  ;;  %v4619_v29 = vpack.c.bf16 %v5421_v26, %v5419_v25  ;;  %v7315_v37 = vand.u32 4294901760, %v5643_v54 }
  0x45   :  { %268 = vmatprep.mubr.f32.mxu0 %v267_v11  ;;  %v494_v0 = vand.u32 4294901760, %v493_v8  ;;  %v501_v1 = vand.u32 4294901760, %v500_v18  ;;  %v381_v9 = vsub.f32 %v5611_v41, %v7316_v7  ;;  %v4621_v6 = vpack.c.bf16 %v5435_v38, %v5425_v28 }
  0x46   :  { %274 = vmatmul.mubr.f32.vlgmr.msra.gmra.mrb[0].mxu0 %v273_v23  ;;  %4610 = vmatpush3.bf16.msra.mxu1 %v4609_v52  ;;  %v388_v57 = vsub.f32 %v5643_v54, %v7315_v37  ;;  %v4623_v11 = vpack.c.bf16 %v5442_v43, %v5439_v40  ;;  %v4625_v23 = vpack.c.bf16 %v5465_v58, %v5447_v46  ;;  %v7470_v52 = vand.u32 4294901760, %v5430_v32 }
  0x47   :  { %4618 = vmatpush3.bf16.msra.mxu0 %v4617_v3  ;;  %v4611_v59 = vpack.c.bf16 %v501_v1, %v494_v0  ;;  %v382_v35 = vand.u32 4294901760, %v381_v9  ;;  %641 = vmatprep.mubr.f32.mxu0 %v5629_v36  ;;  %v4627_v8 = vpack.c.bf16 %v5481_v12, %v5469_v63  ;;  %v7469_v9 = vand.u32 4294901760, %v5428_v31 }
  0x48   :  { %4620 = vmatprep.subr.bf16.mxu0 %v4619_v29  ;;  %v389_v18 = vand.u32 4294901760, %v388_v57  ;;  %v7471_v1 = vand.u32 4294901760, %v5410_v15  ;;  %v7472_v29 = vand.u32 4294901760, %v5414_v21  ;;  %v7473_v37 = vand.u32 4294901760, %v5419_v25 }
  0x49   :  { %4612 = vmatprep.subr.bf16.mxu1 %v4611_v59  ;;  %v4679_v0 = vpack.c.bf16 %v7470_v52, %v7469_v9  ;;  %v7474_v59 = vand.u32 4294901760, %v5421_v26  ;;  %v7475_v13 = vand.u32 4294901760, %v5425_v28  ;;  %v7477_v31 = vand.u32 4294901760, %v5439_v40 }
  0x4a   :  { %v4613_v3 = vpack.c.bf16 %v389_v18, %v382_v35  ;;  %v4681_v57 = vpack.c.bf16 %v7472_v29, %v7471_v1  ;;  %v7476_v35 = vand.u32 4294901760, %v5435_v38  ;;  %v7478_v32 = vand.u32 4294901760, %v5442_v43  ;;  %v7492_v29 = vld [vmem:[#allocation10_spill] sm:$0xff] }
  0x4b   :  { %v4683_v7 = vpack.c.bf16 %v7474_v59, %v7473_v37  ;;  %4622 = vmatpush3.bf16.msra.mxu0 %v4621_v6  ;;  %v7479_v15 = vand.u32 4294901760, %v5447_v46  ;;  %v7480_v21 = vand.u32 4294901760, %v5465_v58  ;;  %v7481_v25 = vand.u32 4294901760, %v5469_v63  ;;  %v88_v59 = vld [vmem:[#allocation2 + $0x188] sm:$0xff] }
  0x4c   :  { %v4685_v18 = vpack.c.bf16 %v7476_v35, %v7475_v13  ;;  %v4687_v9 = vpack.c.bf16 %v7478_v32, %v7477_v31  ;;  %v7482_v26 = vand.u32 4294901760, %v5481_v12  ;;  %4614 = vmatpush3.bf16.msra.mxu1 %v4613_v3  ;;  %4624 = vmatprep.subr.bf16.mxu0 %v4623_v11  ;;  %v7483_v28 = vand.u32 4294901760, %v5485_v17  ;;  %v71_v35 = vld [vmem:[#allocation2 + $0x100] sm:$0xff]  ;;  %v72_v31 = vld [vmem:[#allocation2 + $0x108] sm:$0xff]  ;;  %v7493_v32 = vld [vmem:[#allocation7_spill] sm:$0xff] }
  0x4d   :  { %v5712_v52 = vpack.c.bf16 %v7480_v21, %v7479_v15  ;;  %v7484_v38 = vand.u32 4294901760, %v5496_v42  ;;  %v7485_v43 = vand.u32 4294901760, %v5500_v50  ;;  %v7486_v46 = vand.u32 4294901760, %v5509_v60  ;;  %4648 = vmatprep.subr.bf16.mxu1 %v5408_v14  ;;  %v7494_v15 = vld [vmem:[#allocation8_spill] sm:$0xff] }
  0x4e   :  { %v5718_v37 = vpack.c.bf16 %v7482_v26, %v7481_v25  ;;  %v7487_v63 = vand.u32 4294901760, %v5515_v5  ;;  %v7488_v12 = vand.u32 4294901760, %v5526_v30  ;;  %v4629_v6 = vpack.c.bf16 %v5496_v42, %v5485_v17 }
  0x4f   :  { %v5724_v40 = vpack.c.bf16 %v7484_v38, %v7483_v28  ;;  %v5730_v58 = vpack.c.bf16 %v7486_v46, %v7485_v43  ;;  %506 = vmatmul.mubr.f32.vlgmr.msra.gmra.mrb[0].mxu1 %v5626_v24  ;;  %4626 = vmatpush3.bf16.msra.mxu0 %v4625_v23  ;;  %v4631_v11 = vpack.c.bf16 %v5509_v60, %v5500_v50  ;;  %v7489_v3 = vand.u32 4294901760, %v5629_v36  ;;  %v7490_v36 = vld [vmem:[#allocation5_spill] sm:$0xff]  ;;  %v7491_v23 = vld [vmem:[#allocation6_spill] sm:$0xff]  ;;  %v89_v38 = vld [vmem:[#allocation2 + $0x190] sm:$0xff] }
  0x50   :  { %v5736_v13 = vpack.c.bf16 %v7488_v12, %v7487_v63  ;;  %4650 = vmatpush3.bf16.msra.mxu1 %v5412_v20  ;;  %4628 = vmatprep.subr.bf16.mxu0 %v4627_v8  ;;  %v4633_v1 = vpack.c.bf16 %v5526_v30, %v5515_v5  ;;  %v4635_v17 = vpack.c.bf16 %v5539_v55, %v5530_v51  ;;  %v87_v8 = vld [vmem:[#allocation2 + $0x180] sm:$0xff]  ;;  %v1081_v25 = vand.u32 4294901760, %v88_v59  ;;  %v73_v46 = vld [vmem:[#allocation2 + $0x110] sm:$0xff]  ;;  %v74_v63 = vld [vmem:[#allocation2 + $0x118] sm:$0xff] }
  0x51   :  { %4652 = vmatprep.subr.bf16.mxu1 %v5416_v22  ;;  %748 = vmatprep.mubr.f32.mxu1 %v7489_v3  ;;  %v4637_v42 = vpack.c.bf16 %v5556_v56, %v5545_v61  ;;  %v4639_v50 = vpack.c.bf16 %v5569_v2, %v5560_v10  ;;  %v4641_v60 = vpack.c.bf16 %v5586_v19, %v5575_v53  ;;  %v1078_v21 = vand.u32 4294901760, %v87_v8  ;;  %v7495_v28 = vld [vmem:[#allocation9_spill] sm:$0xff] }
  0x52   :  { %v4643_v5 = vpack.c.bf16 %v5602_v33, %v5590_v44  ;;  %v4645_v30 = vpack.c.bf16 %v5643_v54, %v5611_v41  ;;  %v1030_v26 = vand.u32 4294901760, %v71_v35  ;;  %v5780_v12 = vsub.f32 %v88_v59, %v1081_v25  ;;  %v76_v59 = vld [vmem:[#allocation2 + $0x128] sm:$0xff] }
  0x53   :  { %4630 = vmatpush3.bf16.msra.mxu0 %v4629_v6  ;;  %v5778_v43 = vsub.f32 %v87_v8, %v1078_v21  ;;  %vm3697_vm1 = vcmask 269312   ;;  %vm3699_vm2 = vcmask 277504   ;;  %vm3701_vm3 = vcmask 285696  }
  0x54   :  { %4654 = vmatpush3.bf16.msra.mxu1 %v5423_v27  ;;  %4632 = vmatprep.subr.bf16.mxu0 %v4631_v11  ;;  %v1084_v11 = vand.u32 4294901760, %v89_v38  ;;  %vm3703_vm4 = vcmask 293888  }
  0x55   :  { %4656 = vmatprep.subr.bf16.mxu1 %v5437_v39 }
  0x57   :  { %4634 = vmatpush3.bf16.msra.mxu0 %v4633_v1  ;;  %v7498_v1 = vand.u32 4294901760, %v5545_v61 }
  0x58   :  { %4658 = vmatpush3.bf16.msra.mxu1 %v5445_v45  ;;  %4636 = vmatprep.subr.bf16.mxu0 %v4635_v17  ;;  %v7499_v17 = vand.u32 4294901760, %v5556_v56  ;;  %v7504_v56 = vand.u32 4294901760, %v5590_v44  ;;  %v7327_v44 = vand.u32 4294901760, %v5780_v12 }
  0x59   :  { %4660 = vmatprep.subr.bf16.mxu1 %v5467_v62 }
  0x5b   :  { %4638 = vmatpush3.bf16.msra.mxu0 %v4637_v42  ;;  %v4701_v42 = vpack.c.bf16 %v7499_v17, %v7498_v1  ;;  %v93_v17 = vld [vmem:[#allocation2 + $0x1b0] sm:$0xff] }
  0x5c   :  { %4662 = vmatpush3.bf16.msra.mxu1 %v5483_v16  ;;  %4640 = vmatprep.subr.bf16.mxu0 %v4639_v50  ;;  %v91_v50 = vld [vmem:[#allocation2 + $0x1a0] sm:$0xff] }
  0x5d   :  { %4664 = vmatprep.subr.bf16.mxu1 %v5498_v49 }
  0x5f   :  { %4642 = vmatpush3.bf16.msra.mxu0 %v4641_v60  ;;  %v92_v60 = vld [vmem:[#allocation2 + $0x1a8] sm:$0xff] }
  0x60   :  { %4666 = vmatpush3.bf16.msra.mxu1 %v5513_v4  ;;  %4644 = vmatprep.subr.bf16.mxu0 %v4643_v5 }
  0x61   :  { %4668 = vmatprep.subr.bf16.mxu1 %v5528_v48 }
  0x63   :  { %4646 = vmatpush3.bf16.msra.mxu0 %v4645_v30  ;;  %v7507_v30 = vand.u32 4294901760, %v5643_v54 }
  0x64   :  { %4670 = vmatpush3.bf16.msra.mxu1 %v7490_v36  ;;  %4680 = vmatprep.subr.bf16.mxu0 %v4679_v0  ;;  %v1033_v0 = vand.u32 4294901760, %v72_v31 }
  0x65   :  { %4672 = vmatprep.subr.bf16.mxu1 %v7491_v23 }
  0x66   :  { %644 = vmatmul.mubr.f32.vlgmr.msra.gmra.mrb[2].mxu0 %v5639_v47  ;;  %v5784_v6 = vsub.f32 %v72_v31, %v1033_v0  ;;  %v7500_v47 = vand.u32 4294901760, %v5560_v10  ;;  %v7505_v10 = vand.u32 4294901760, %v5602_v33  ;;  %v75_v33 = vld [vmem:[#allocation2 + $0x120] sm:$0xff]  ;;  %v1090_v31 = vand.u32 4294901760, %v91_v50 }
  0x67   :  { %4682 = vmatpush3.bf16.msra.mxu0 %v4681_v57  ;;  %918 = vmatprep.mubr.f32.mxu0 %v7492_v29  ;;  %v90_v57 = vld [vmem:[#allocation2 + $0x198] sm:$0xff] }
  0x68   :  { %4674 = vmatpush3.bf16.msra.mxu1 %v7493_v32  ;;  %4684 = vmatprep.subr.bf16.mxu0 %v4683_v7  ;;  %v5782_v7 = vsub.f32 %v71_v35, %v1030_v26  ;;  %v1087_v3 = vand.u32 4294901760, %v90_v57  ;;  %v5816_v5 = vpack.c.bf16 %v7505_v10, %v7504_v56  ;;  %v7318_v54 = vand.u32 4294901760, %v5784_v6 }
  0x69   :  { %4676 = vmatprep.subr.bf16.mxu1 %v7494_v15  ;;  %v5835_v35 = vpack.c.bf16 %v1033_v0, %v1030_v26  ;;  %v1042_v0 = vand.u32 4294901760, %v75_v33 }
  0x6b   :  { %4686 = vmatpush3.bf16.msra.mxu0 %v4685_v18  ;;  %v7496_v18 = vand.u32 4294901760, %v5530_v51  ;;  %v1036_v51 = vand.u32 4294901760, %v73_v46  ;;  %7508 = vst [vmem:[#allocation5_spill] sm:$0xff] %v5835_v35 }
  0x6c   :  { %4678 = vmatpush3.bf16.msra.mxu1 %v7495_v28  ;;  %4688 = vmatprep.subr.bf16.mxu0 %v4687_v9  ;;  %v7497_v9 = vand.u32 4294901760, %v5539_v55  ;;  %v1039_v55 = vand.u32 4294901760, %v74_v63 }
  0x6d   :  { %4712 = vmatprep.subr.bf16.mxu1 %v5408_v14 }
  0x6e   :  { %v4699_v14 = vpack.c.bf16 %v7497_v9, %v7496_v18  ;;  %v1093_v18 = vand.u32 4294901760, %v92_v60  ;;  %v5845_v9 = vpack.c.bf16 %v1039_v55, %v1036_v51 }
  0x6f   :  { %752 = vmatmul.mubr.f32.vlgmr.msra.gmra.mrb[2].mxu1 %v271_v34  ;;  %4690 = vmatpush3.bf16.msra.mxu0 %v5712_v52  ;;  %v7501_v34 = vand.u32 4294901760, %v5569_v2  ;;  %v7506_v2 = vand.u32 4294901760, %v5611_v41  ;;  %v7324_v41 = vand.u32 4294901760, %v5782_v7 }
  0x70   :  { %4714 = vmatpush3.bf16.msra.mxu1 %v5412_v20  ;;  %4692 = vmatprep.subr.bf16.mxu0 %v5718_v37  ;;  %v7502_v20 = vand.u32 4294901760, %v5575_v53  ;;  %v7503_v37 = vand.u32 4294901760, %v5586_v19  ;;  %v34_v53 = vld [vmem:[%s7268_s0 + $0x18] sm:$0xff]  ;;  %v5829_v19 = vpack.c.bf16 %v1081_v25, %v1078_v21  ;;  %v5841_v21 = vsub.f32 %v89_v38, %v1084_v11  ;;  %7510 = vst [vmem:[#allocation10_spill] sm:$0xff] %v5845_v9 }
  0x71   :  { %v5803_v52 = vpack.c.bf16 %v7501_v34, %v7500_v47  ;;  %4716 = vmatprep.subr.bf16.mxu1 %v5416_v22  ;;  %v5822_v8 = vpack.c.bf16 %v7507_v30, %v7506_v2  ;;  %1022 = vmatprep.mubr.f32.mxu1 %v7492_v29  ;;  %v7328_v22 = vand.u32 4294901760, %v5778_v43  ;;  %v5837_v29 = vpack.c.bf16 %v1087_v3, %v1084_v11 }
  0x72   :  { %v5810_v61 = vpack.c.bf16 %v7503_v37, %v7502_v20  ;;  %v5843_v25 = vsub.f32 %v90_v57, %v1087_v3  ;;  %v5847_v1 = vand.u32 4294901760, %v34_v53  ;;  %v5855_v38 = vsub.f32 %v74_v63, %v1039_v55  ;;  %v77_v37 = vld [vmem:[#allocation2 + $0x130] sm:$0xff] }
  0x73   :  { %4694 = vmatpush3.bf16.msra.mxu0 %v5724_v40  ;;  %7509 = vst [vmem:[#allocation6_spill] sm:$0xff] %v5837_v29  ;;  %v5850_v40 = vsub.f32 %v73_v46, %v1036_v51  ;;  %v1257_v26 = vsub.f32 %v5778_v43, %v7328_v22  ;;  %v1264_v57 = vsub.f32 %v5780_v12, %v7327_v44  ;;  %v1096_v34 = vand.u32 4294901760, %v93_v17  ;;  %v82_v22 = vld [vmem:[#allocation2 + $0x158] sm:$0xff] }
  0x74   :  { %4718 = vmatpush3.bf16.msra.mxu1 %v5423_v27  ;;  %4696 = vmatprep.subr.bf16.mxu0 %v5730_v58  ;;  %7511 = vst [vmem:[#allocation7_spill] sm:$0xff] %v5847_v1  ;;  %v1045_v27 = vand.u32 4294901760, %v76_v59  ;;  %v94_v58 = vld [vmem:[#allocation2 + $0x1b8] sm:$0xff]  ;;  %v1152_v46 = vsub.f32 %v5784_v6, %v7318_v54  ;;  %v5867_v11 = vpack.c.bf16 %v1093_v18, %v1090_v31  ;;  %v7322_v55 = vand.u32 4294901760, %v5841_v21  ;;  %v95_v54 = vld [vmem:[#allocation2 + $0x1c0] sm:$0xff] }
  0x75   :  { %4720 = vmatprep.subr.bf16.mxu1 %v5437_v39  ;;  %v1145_v39 = vsub.f32 %v5782_v7, %v7324_v41  ;;  %v5869_v3 = vsub.f32 %v91_v50, %v1090_v31  ;;  %v5871_v63 = vsub.f32 %v92_v60, %v1093_v18  ;;  %v5874_v47 = vsub.f32 %v34_v53, %v5847_v1 }
  0x76   :  { %7512 = vst [vmem:[#allocation8_spill] sm:$0xff] %v5867_v11  ;;  %v1099_v51 = vand.u32 4294901760, %v94_v58  ;;  %v7319_v20 = vand.u32 4294901760, %v5843_v25  ;;  %v1258_v50 = vand.u32 4294901760, %v1257_v26  ;;  %v5880_v56 = vpack.c.bf16 %v1045_v27, %v1042_v0 }
  0x77   :  { %4698 = vmatpush3.bf16.msra.mxu0 %v5736_v13  ;;  %v78_v13 = vld [vmem:[#allocation2 + $0x138] sm:$0xff]  ;;  %v5882_v60 = vsub.f32 %v75_v33, %v1042_v0  ;;  %v5884_v10 = vsub.f32 %v76_v59, %v1045_v27  ;;  %v1265_v2 = vand.u32 4294901760, %v1264_v57  ;;  %v7321_v30 = vand.u32 4294901760, %v5850_v40  ;;  %v96_v27 = vld [vmem:[#allocation2 + $0x1c8] sm:$0xff] }
  0x78   :  { %4722 = vmatpush3.bf16.msra.mxu1 %v5445_v45  ;;  %4700 = vmatprep.subr.bf16.mxu0 %v4699_v14  ;;  %7513 = vst [vmem:[#allocation9_spill] sm:$0xff] %v5880_v56  ;;  %v1146_v45 = vand.u32 4294901760, %v1145_v39  ;;  %v1153_v14 = vand.u32 4294901760, %v1152_v46  ;;  %v1048_v53 = vand.u32 4294901760, %v77_v37  ;;  %v1051_v31 = vand.u32 4294901760, %v78_v13 }
  0x79   :  { %4724 = vmatprep.subr.bf16.mxu1 %v5467_v62  ;;  %v7320_v18 = vand.u32 4294901760, %v5855_v38  ;;  %v7331_v62 = vand.u32 4294901760, %v5874_v47  ;;  %v5891_v33 = vpack.c.bf16 %v1099_v51, %v1096_v34  ;;  %v1271_v59 = vsub.f32 %v5841_v21, %v7322_v55 }
  0x7a   :  { %v5900_v26 = vsub.f32 %v93_v17, %v1096_v34  ;;  %v5902_v0 = vsub.f32 %v94_v58, %v1099_v51  ;;  %v5906_v57 = vpack.c.bf16 %v1265_v2, %v1258_v50  ;;  %v5908_v39 = vpack.c.bf16 %v1153_v14, %v1146_v45 }
  0x7b   :  { %4702 = vmatpush3.bf16.msra.mxu0 %v4701_v42  ;;  %7514 = vst [vmem:[#allocation11_spill] sm:$0xff] %v5891_v33  ;;  %v1278_v42 = vsub.f32 %v5843_v25, %v7319_v20  ;;  %v1159_v46 = vsub.f32 %v5850_v40, %v7321_v30  ;;  %v1102_v20 = vand.u32 4294901760, %v95_v54  ;;  %v1166_v17 = vsub.f32 %v5855_v38, %v7320_v18 }
  0x7c   :  { %4726 = vmatpush3.bf16.msra.mxu1 %v5483_v16  ;;  %4704 = vmatprep.subr.bf16.mxu0 %v5803_v52  ;;  %v7323_v16 = vand.u32 4294901760, %v5869_v3  ;;  %v7326_v52 = vand.u32 4294901760, %v5871_v63  ;;  %v7325_v58 = vand.u32 4294901760, %v5882_v60  ;;  %v1128_v34 = vsub.f32 %v5874_v47, %v7331_v62 }
  0x7d   :  { %4728 = vmatprep.subr.bf16.mxu1 %v5498_v49  ;;  %v5914_v49 = vpack.c.bf16 %v1051_v31, %v1048_v53  ;;  %v1272_v51 = vand.u32 4294901760, %v1271_v59  ;;  %v1279_v50 = vand.u32 4294901760, %v1278_v42  ;;  %v1105_v2 = vand.u32 4294901760, %v96_v27  ;;  %v80_v42 = vld [vmem:[#allocation2 + $0x148] sm:$0xff] }
  0x7e   :  { %v7330_v45 = vand.u32 4294901760, %v5884_v10  ;;  %v5927_v14 = vsub.f32 %v77_v37, %v1048_v53  ;;  %v5929_v18 = vsub.f32 %v78_v13, %v1051_v31  ;;  %v1285_v30 = vsub.f32 %v5869_v3, %v7323_v16  ;;  %v97_v31 = vld [vmem:[#allocation2 + $0x1d0] sm:$0xff]  ;;  %v98_v16 = vld [vmem:[#allocation2 + $0x1d8] sm:$0xff] }
  0x7f   :  { %4706 = vmatpush3.bf16.msra.mxu0 %v5810_v61  ;;  %7515 = vst [vmem:[#allocation12_spill] sm:$0xff] %v5914_v49  ;;  %v79_v61 = vld [vmem:[#allocation2 + $0x140] sm:$0xff]  ;;  %v5937_v59 = vsub.f32 %v95_v54, %v1102_v20  ;;  %v7329_v55 = vand.u32 4294901760, %v5900_v26  ;;  %v1167_v37 = vand.u32 4294901760, %v1166_v17  ;;  %v1173_v53 = vsub.f32 %v5882_v60, %v7325_v58 }
  0x80   :  { %4730 = vmatpush3.bf16.msra.mxu1 %v5513_v4  ;;  %4708 = vmatprep.subr.bf16.mxu0 %v5816_v5  ;;  %v1292_v4 = vsub.f32 %v5871_v63, %v7326_v52  ;;  %v1160_v5 = vand.u32 4294901760, %v1159_v46  ;;  %v1054_v13 = vand.u32 4294901760, %v79_v61  ;;  %v1129_v41 = vand.u32 4294901760, %v1128_v34  ;;  %v81_v34 = vld [vmem:[#allocation2 + $0x150] sm:$0xff] }
  0x81   :  { %4732 = vmatprep.subr.bf16.mxu1 %v5528_v48  ;;  %v7332_v48 = vand.u32 4294901760, %v5902_v0  ;;  %v5947_v54 = vpack.c.bf16 %v1279_v50, %v1272_v51  ;;  %v5949_v46 = vpack.c.bf16 %v1105_v2, %v1102_v20  ;;  %v5955_v17 = vsub.f32 %v96_v27, %v1105_v2 }
  0x82   :  { %v1286_v58 = vand.u32 4294901760, %v1285_v30  ;;  %v1293_v52 = vand.u32 4294901760, %v1292_v4  ;;  %v1057_v44 = vand.u32 4294901760, %v80_v42  ;;  %v1111_v51 = vand.u32 4294901760, %v98_v16 }
  0x83   :  { %4710 = vmatpush3.bf16.msra.mxu0 %v5822_v8  ;;  %7516 = vst [vmem:[#allocation13_spill] sm:$0xff] %v5949_v46  ;;  %v1180_v8 = vsub.f32 %v5884_v10, %v7330_v45  ;;  %v1299_v20 = vsub.f32 %v5900_v26, %v7329_v55  ;;  %v1306_v50 = vsub.f32 %v5902_v0, %v7332_v48  ;;  %v1174_v27 = vand.u32 4294901760, %v1173_v53  ;;  %v99_v48 = vld [vmem:[#allocation2 + $0x1e0] sm:$0xff]  ;;  %v100_v53 = vld [vmem:[#allocation2 + $0x1e8] sm:$0xff] }
  0x84   :  { %4734 = vmatpush3.bf16.msra.mxu1 %v7490_v36  ;;  %4744 = vmatprep.subr.bf16.mxu0 %v5829_v19  ;;  %v1108_v36 = vand.u32 4294901760, %v97_v31  ;;  %v5967_v30 = vsub.f32 %v79_v61, %v1054_v13  ;;  %v1060_v55 = vand.u32 4294901760, %v81_v34  ;;  %v1063_v45 = vand.u32 4294901760, %v82_v22 }
  0x85   :  { %4736 = vmatprep.subr.bf16.mxu1 %v7491_v23  ;;  %v5965_v23 = vpack.c.bf16 %v1167_v37, %v1160_v5  ;;  %v1181_v4 = vand.u32 4294901760, %v1180_v8  ;;  %v7337_v62 = vand.u32 4294901760, %v5929_v18  ;;  %v5974_v5 = vpack.c.bf16 %v1293_v52, %v1286_v58 }
  0x86   :  { %920 = vmatmul.mubr.f32.vlgmr.msra.gmra.mrb[4].mxu0 %v5626_v24  ;;  %v5976_v61 = vpack.c.bf16 %v1057_v44, %v1054_v13  ;;  %v5978_v37 = vsub.f32 %v80_v42, %v1057_v44  ;;  %v1300_v2 = vand.u32 4294901760, %v1299_v20  ;;  %v1307_v8 = vand.u32 4294901760, %v1306_v50  ;;  %v6011_v50 = vld [vmem:[#allocation2 + $0x168] sm:$0xff] }
  0x87   :  { %4746 = vmatpush3.bf16.msra.mxu0 %v5835_v35  ;;  %1130 = vmatprep.mubr.f32.mxu0 %v1129_v41  ;;  %v7339_v41 = vand.u32 4294901760, %v5937_v59  ;;  %v5984_v35 = vld [vmem:[#allocation2 + $0x160] sm:$0xff]  ;;  %v5989_v52 = vsub.f32 %v98_v16, %v1111_v51  ;;  %v7520_v44 = vand.u32 4294901760, %v5927_v14  ;;  %v1114_v42 = vand.u32 4294901760, %v99_v48 }
  0x88   :  { %4738 = vmatpush3.bf16.msra.mxu1 %v7493_v32  ;;  %4748 = vmatprep.subr.bf16.mxu0 %v5837_v29  ;;  %v5981_v32 = vpack.c.bf16 %v1111_v51, %v1108_v36  ;;  %v7338_v29 = vand.u32 4294901760, %v5955_v17  ;;  %v5996_v13 = vpack.c.bf16 %v1181_v4, %v1174_v27  ;;  %v5998_v20 = vpack.c.bf16 %v1063_v45, %v1060_v55 }
  0x89   :  { %4740 = vmatprep.subr.bf16.mxu1 %v7494_v15  ;;  %v5987_v15 = vsub.f32 %v97_v31, %v1108_v36  ;;  %7519 = vst [vmem:[#allocation16_spill] sm:$0xff] %v5989_v52  ;;  %v1187_v58 = vsub.f32 %v5927_v14, %v7520_v44  ;;  %v1194_v31 = vsub.f32 %v5929_v18, %v7337_v62  ;;  %v1117_v36 = vand.u32 4294901760, %v100_v53  ;;  %v6047_v62 = vld [vmem:[#allocation2 + $0x170] sm:$0xff] }
  0x8a   :  { %7517 = vst [vmem:[#allocation14_spill] sm:$0xff] %v5981_v32  ;;  %v6004_v16 = vsub.f32 %v81_v34, %v1060_v55  ;;  %v6006_v51 = vsub.f32 %v82_v22, %v1063_v45  ;;  %v7340_v27 = vand.u32 4294901760, %v5984_v35  ;;  %v4787_v4 = vpack.c.bf16 %v1307_v8, %v1300_v2  ;;  %v6021_v22 = vld [vmem:[#allocation2 + $0x1f8] sm:$0xff] }
  0x8b   :  { %4750 = vmatpush3.bf16.msra.mxu0 %v5845_v9  ;;  %7518 = vst [vmem:[#allocation15_spill] sm:$0xff] %v5987_v15  ;;  %v1320_v44 = vsub.f32 %v5955_v17, %v7338_v29  ;;  %v1188_v45 = vand.u32 4294901760, %v1187_v58  ;;  %v6025_v34 = vsub.f32 %v99_v48, %v1114_v42  ;;  %v33_v29 = vld [vmem:[%s7268_s0 + $0x10] sm:$0xff]  ;;  %v6034_v55 = vpack.c.bf16 %v1117_v36, %v1114_v42  ;;  %v6049_v42 = vld [vmem:[#allocation2 + $0x178] sm:$0xff] }
  0x8c   :  { %4742 = vmatpush3.bf16.msra.mxu1 %v7495_v28  ;;  %4752 = vmatprep.subr.bf16.mxu0 %v5867_v11  ;;  %v1313_v28 = vsub.f32 %v5937_v59, %v7339_v41  ;;  %v1195_v41 = vand.u32 4294901760, %v1194_v31  ;;  %v1069_v48 = vand.u32 4294901760, %v6011_v50  ;;  %v6043_v8 = vsub.f32 %v5984_v35, %v7340_v27 }
  0x8d   :  { %4776 = vmatprep.subr.bf16.mxu1 %v5906_v57  ;;  %v6019_v57 = vld [vmem:[#allocation2 + $0x1f0] sm:$0xff]  ;;  %v7521_v31 = vand.u32 4294901760, %v5967_v30  ;;  %v6058_v27 = vand.u32 4294901760, %v33_v29  ;;  %v7524_v11 = vand.u32 4294901760, %v5989_v52 }
  0x8e   :  { %v1314_v58 = vand.u32 4294901760, %v1313_v28  ;;  %v1120_v2 = vand.u32 4294901760, %v6019_v57  ;;  %v6072_v9 = vsub.f32 %v6011_v50, %v1069_v48 }
  0x8f   :  { %1024 = vmatmul.mubr.f32.vlgmr.msra.gmra.mrb[4].mxu1 %v5626_v24  ;;  %4754 = vmatpush3.bf16.msra.mxu0 %v5880_v56  ;;  %v6036_v24 = vsub.f32 %v100_v53, %v1117_v36  ;;  %v1321_v53 = vand.u32 4294901760, %v1320_v44  ;;  %v7522_v36 = vand.u32 4294901760, %v5978_v37  ;;  %v1334_v44 = vsub.f32 %v5989_v52, %v7524_v11 }
  0x90   :  { %4778 = vmatpush3.bf16.msra.mxu1 %v5908_v39  ;;  %4756 = vmatprep.subr.bf16.mxu0 %v5891_v33  ;;  %v1123_v39 = vand.u32 4294901760, %v6021_v22  ;;  %v7523_v33 = vand.u32 4294901760, %v5987_v15  ;;  %v6078_v11 = vsub.f32 %v6019_v57, %v1120_v2  ;;  %v7525_v57 = vand.u32 4294901760, %v6004_v16 }
  0x91   :  { %4780 = vmatprep.subr.bf16.mxu1 %v5947_v54  ;;  %1366 = vmatprep.mubr.f32.mxu1 %v5847_v1  ;;  %v1201_v54 = vsub.f32 %v5967_v30, %v7521_v31  ;;  %v1208_v28 = vsub.f32 %v5978_v37, %v7522_v36  ;;  %v4789_v36 = vpack.c.bf16 %v1195_v41, %v1188_v45  ;;  %v7361_v31 = vand.u32 4294901760, %v6036_v24 }
  0x92   :  { %v1327_v56 = vsub.f32 %v5987_v15, %v7523_v33  ;;  %v1075_v33 = vand.u32 4294901760, %v6049_v42  ;;  %v6081_v1 = vsub.f32 %v6021_v22, %v1123_v39  ;;  %v4791_v41 = vpack.c.bf16 %v1321_v53, %v1314_v58 }
  0x93   :  { %4758 = vmatpush3.bf16.msra.mxu0 %v5914_v49  ;;  %v1072_v49 = vand.u32 4294901760, %v6047_v62  ;;  %v1202_v45 = vand.u32 4294901760, %v1201_v54  ;;  %v1209_v50 = vand.u32 4294901760, %v1208_v28  ;;  %v1215_v15 = vsub.f32 %v6004_v16, %v7525_v57 }
  0x94   :  { %4782 = vmatpush3.bf16.msra.mxu1 %v5965_v23  ;;  %4760 = vmatprep.subr.bf16.mxu0 %v5949_v46  ;;  %v6086_v46 = vsub.f32 %v33_v29, %v6058_v27  ;;  %v1328_v52 = vand.u32 4294901760, %v1327_v56  ;;  %v7526_v22 = vand.u32 4294901760, %v6006_v51  ;;  %v6101_v29 = vsub.f32 %v6049_v42, %v1075_v33 }
  0x95   :  { %4784 = vmatprep.subr.bf16.mxu1 %v5974_v5  ;;  %v1335_v5 = vand.u32 4294901760, %v1334_v44  ;;  %v6098_v58 = vsub.f32 %v6047_v62, %v1072_v49  ;;  %v7527_v54 = vand.u32 4294901760, %v6025_v34  ;;  %v1354_v44 = vand.u32 4294901760, %v6078_v11 }
  0x96   :  { %v1222_v23 = vsub.f32 %v6006_v51, %v7526_v22  ;;  %v7528_v42 = vand.u32 4294901760, %v5984_v35  ;;  %v6117_v22 = vpack.c.bf16 %v1123_v39, %v1120_v2  ;;  %v4793_v53 = vpack.c.bf16 %v1209_v50, %v1202_v45 }
  0x97   :  { %4762 = vmatpush3.bf16.msra.mxu0 %v5976_v61  ;;  %v1341_v28 = vsub.f32 %v6025_v34, %v7527_v54  ;;  %v4795_v54 = vpack.c.bf16 %v1335_v5, %v1328_v52  ;;  %v1216_v56 = vand.u32 4294901760, %v1215_v15  ;;  %v7530_v35 = vand.u32 4294901760, %v6072_v9 }
  0x98   :  { %4786 = vmatpush3.bf16.msra.mxu1 %v5996_v13  ;;  %4764 = vmatprep.subr.bf16.mxu0 %v5981_v32  ;;  %v1348_v13 = vsub.f32 %v6036_v24, %v7361_v31  ;;  %v6115_v57 = vpack.c.bf16 %v1069_v48, %v7528_v42  ;;  %v1223_v32 = vand.u32 4294901760, %v1222_v23  ;;  %v7529_v31 = vand.u32 4294901760, %v6043_v8 }
  0x99   :  { %4788 = vmatprep.subr.bf16.mxu1 %v4787_v4  ;;  %v1133_v4 = vand.u32 4294901760, %v6086_v46  ;;  %v1236_v2 = vsub.f32 %v6072_v9, %v7530_v35  ;;  %v7362_v48 = vand.u32 4294901760, %v6098_v58  ;;  %v7363_v39 = vand.u32 4294901760, %v6101_v29 }
  0x9a   :  { %v1229_v62 = vsub.f32 %v6043_v8, %v7529_v31  ;;  %v1342_v45 = vand.u32 4294901760, %v1341_v28  ;;  %v1349_v52 = vand.u32 4294901760, %v1348_v13  ;;  %v1355_v15 = vsub.f32 %v6078_v11, %v1354_v44 }
  0x9b   :  { %4766 = vmatpush3.bf16.msra.mxu0 %v5998_v20  ;;  %v1134_v31 = vsub.f32 %v6086_v46, %v1133_v4  ;;  %v6140_v50 = vpack.c.bf16 %v1075_v33, %v1072_v49  ;;  %v4797_v5 = vpack.c.bf16 %v1223_v32, %v1216_v56  ;;  %v1237_v13 = vand.u32 4294901760, %v1236_v2 }
  0x9c   :  { %4790 = vmatpush3.bf16.msra.mxu1 %v4789_v36  ;;  %4768 = vmatprep.subr.bf16.mxu0 %v6034_v55  ;;  %v7531_v36 = vand.u32 4294901760, %v6081_v1  ;;  %v1230_v28 = vand.u32 4294901760, %v1229_v62  ;;  %v1243_v42 = vsub.f32 %v6098_v58, %v7362_v48  ;;  %v1250_v35 = vsub.f32 %v6101_v29, %v7363_v39 }
  0x9d   :  { %4792 = vmatprep.subr.bf16.mxu1 %v4791_v41  ;;  %v4807_v41 = vpack.c.bf16 %v5780_v12, %v5778_v43  ;;  %v4799_v49 = vpack.c.bf16 %v1349_v52, %v1342_v45  ;;  %v1356_v33 = vand.u32 4294901760, %v1355_v15  ;;  %v1135_v56 = vand.u32 4294901760, %v1134_v31  ;;  %v7532_v31 = vld [vmem:[#allocation5_spill] sm:$0xff] }
  0x9e   :  { %v1362_v23 = vsub.f32 %v6081_v1, %v7531_v36  ;;  %v4801_v62 = vpack.c.bf16 %v1237_v13, %v1230_v28  ;;  %v4811_v2 = vpack.c.bf16 %v5843_v25, %v5841_v21  ;;  %v1244_v36 = vand.u32 4294901760, %v1243_v42  ;;  %v7535_v13 = vld [vmem:[#allocation10_spill] sm:$0xff]  ;;  %v7536_v42 = vld [vmem:[#allocation15_spill] sm:$0xff] }
  0x9f   :  { %4770 = vmatpush3.bf16.msra.mxu0 %v6115_v57  ;;  %v1251_v48 = vand.u32 4294901760, %v1250_v35  ;;  %v4815_v52 = vpack.c.bf16 %v5871_v63, %v5869_v3  ;;  %v4817_v15 = vpack.c.bf16 %v5884_v10, %v5882_v60  ;;  %v4825_v28 = vpack.c.bf16 %v5978_v37, %v5967_v30  ;;  %v7537_v35 = vld [vmem:[#allocation16_spill] sm:$0xff] }
  0xa0   :  { %4794 = vmatpush3.bf16.msra.mxu1 %v4793_v53  ;;  %4772 = vmatprep.subr.bf16.mxu0 %v6117_v22  ;;  %v1363_v32 = vand.u32 4294901760, %v1362_v23  ;;  %v4809_v53 = vpack.c.bf16 %v5784_v6, %v5782_v7  ;;  %v4819_v23 = vpack.c.bf16 %v5902_v0, %v5900_v26 }
  0xa1   :  { %4796 = vmatprep.subr.bf16.mxu1 %v4795_v54  ;;  %v4813_v54 = vpack.c.bf16 %v5855_v38, %v5850_v40  ;;  %v4805_v45 = vpack.c.bf16 %v1251_v48, %v1244_v36  ;;  %v4821_v48 = vpack.c.bf16 %v5929_v18, %v5927_v14  ;;  %v4835_v36 = vpack.c.bf16 %v6081_v1, %v6078_v11 }
  0xa2   :  { %v4803_v39 = vpack.c.bf16 %v1363_v32, %v1356_v33  ;;  %v7538_v33 = vld [vmem:[#allocation8_spill] sm:$0xff]  ;;  %v4829_v32 = vpack.c.bf16 %v6006_v51, %v6004_v16 }
  0xa3   :  { %4774 = vmatpush3.bf16.msra.mxu0 %v6140_v50 }
  0xa4   :  { %4798 = vmatpush3.bf16.msra.mxu1 %v4797_v5  ;;  %4808 = vmatprep.subr.bf16.mxu0 %v4807_v41  ;;  %v7533_v5 = vld [vmem:[#allocation6_spill] sm:$0xff]  ;;  %v7534_v41 = vand.u32 4294901760, %v5874_v47 }
  0xa5   :  { %4800 = vmatprep.subr.bf16.mxu1 %v4799_v49  ;;  %v4827_v49 = vpack.c.bf16 %v7537_v35, %v7536_v42 }
  0xa6   :  { %1136 = vmatmul.mubr.f32.vlgmr.msra.gmra.mrb[6].mxu0 %v1135_v56  ;;  %v7539_v56 = vld [vmem:[#allocation9_spill] sm:$0xff] }
  0xa7   :  { %4810 = vmatpush3.bf16.msra.mxu0 %v4809_v53  ;;  %1503 = vmatprep.mubr.f32.mxu0 %v5874_v47  ;;  %v4831_v47 = vpack.c.bf16 %v6036_v24, %v6025_v34  ;;  %v7540_v53 = vld [vmem:[#allocation11_spill] sm:$0xff] }
  0xa8   :  { %4802 = vmatpush3.bf16.msra.mxu1 %v4801_v62  ;;  %4812 = vmatprep.subr.bf16.mxu0 %v4811_v2  ;;  %v4833_v62 = vpack.c.bf16 %v6072_v9, %v6043_v8  ;;  %v7541_v2 = vld [vmem:[#allocation12_spill] sm:$0xff] }
  0xa9   :  { %4804 = vmatprep.subr.bf16.mxu1 %v4803_v39  ;;  %v4823_v39 = vpack.c.bf16 %v5955_v17, %v5937_v59 }
  0xab   :  { %4814 = vmatpush3.bf16.msra.mxu0 %v4813_v54  ;;  %v7542_v54 = vld [vmem:[#allocation13_spill] sm:$0xff] }
  0xac   :  { %4806 = vmatpush3.bf16.msra.mxu1 %v4805_v45  ;;  %4816 = vmatprep.subr.bf16.mxu0 %v4815_v52  ;;  %v4837_v45 = vpack.c.bf16 %v6101_v29, %v6098_v58  ;;  %v7543_v52 = vand.u32 4294901760, %v5778_v43  ;;  %v119_v43 = vld [vmem:[#allocation2 + $0x280] sm:$0xff] }
  0xad   :  { %4840 = vmatprep.subr.bf16.mxu1 %v5829_v19 }
  0xaf   :  { %1368 = vmatmul.mubr.f32.vlgmr.msra.gmra.mrb[6].mxu1 %v6058_v27  ;;  %4818 = vmatpush3.bf16.msra.mxu0 %v4817_v15  ;;  %v7544_v15 = vand.u32 4294901760, %v5780_v12  ;;  %v7550_v12 = vand.u32 4294901760, %v5850_v40  ;;  %v7555_v40 = vand.u32 4294901760, %v5882_v60  ;;  %v7559_v60 = vand.u32 4294901760, %v5927_v14 }
  0xb0   :  { %4842 = vmatpush3.bf16.msra.mxu1 %v7532_v31  ;;  %4820 = vmatprep.subr.bf16.mxu0 %v4819_v23  ;;  %v7566_v14 = vand.u32 4294901760, %v7537_v35 }
  0xb1   :  { %4844 = vmatprep.subr.bf16.mxu1 %v7533_v5  ;;  %1610 = vmatprep.mubr.f32.mxu1 %v7534_v41  ;;  %v4871_v23 = vpack.c.bf16 %v7544_v15, %v7543_v52  ;;  %v7547_v41 = vand.u32 4294901760, %v5784_v6  ;;  %v1940_v52 = vand.u32 4294901760, %v119_v43  ;;  %v103_v15 = vld [vmem:[#allocation2 + $0x200] sm:$0xff] }
  0xb3   :  { %4822 = vmatpush3.bf16.msra.mxu0 %v4821_v48  ;;  %v7545_v48 = vld [vmem:[#allocation14_spill] sm:$0xff] }
  0xb4   :  { %4846 = vmatpush3.bf16.msra.mxu1 %v7535_v13  ;;  %4824 = vmatprep.subr.bf16.mxu0 %v4823_v39  ;;  %v7546_v39 = vand.u32 4294901760, %v5782_v7  ;;  %v7551_v7 = vand.u32 4294901760, %v5855_v38  ;;  %v7556_v38 = vand.u32 4294901760, %v5884_v10  ;;  %v7560_v10 = vand.u32 4294901760, %v5929_v18 }
  0xb5   :  { %4848 = vmatprep.subr.bf16.mxu1 %v7538_v33 }
  0xb6   :  { %v4877_v6 = vpack.c.bf16 %v7551_v7, %v7550_v12  ;;  %v4885_v7 = vpack.c.bf16 %v7560_v10, %v7559_v60  ;;  %v124_v10 = vld [vmem:[#allocation2 + $0x2a8] sm:$0xff] }
  0xb7   :  { %4826 = vmatpush3.bf16.msra.mxu0 %v4825_v28  ;;  %v4873_v28 = vpack.c.bf16 %v7547_v41, %v7546_v39  ;;  %v4881_v39 = vpack.c.bf16 %v7556_v38, %v7555_v40  ;;  %v106_v40 = vld [vmem:[#allocation2 + $0x218] sm:$0xff]  ;;  %v7564_v38 = vand.u32 4294901760, %v5978_v37  ;;  %v7569_v37 = vand.u32 4294901760, %v6025_v34 }
  0xb8   :  { %4850 = vmatpush3.bf16.msra.mxu1 %v7539_v56  ;;  %4828 = vmatprep.subr.bf16.mxu0 %v4827_v49  ;;  %v7548_v49 = vand.u32 4294901760, %v5841_v21  ;;  %v7553_v21 = vand.u32 4294901760, %v5869_v3  ;;  %v7557_v3 = vand.u32 4294901760, %v5900_v26  ;;  %v105_v26 = vld [vmem:[#allocation2 + $0x210] sm:$0xff]  ;;  %v7571_v34 = vand.u32 4294901760, %v6043_v8 }
  0xb9   :  { %4852 = vmatprep.subr.bf16.mxu1 %v7540_v53  ;;  %v7575_v8 = vand.u32 4294901760, %v6101_v29 }
  0xbb   :  { %4830 = vmatpush3.bf16.msra.mxu0 %v4829_v32  ;;  %v7549_v32 = vand.u32 4294901760, %v5843_v25  ;;  %v7554_v25 = vand.u32 4294901760, %v5871_v63  ;;  %v7558_v63 = vand.u32 4294901760, %v5902_v0  ;;  %v7563_v0 = vand.u32 4294901760, %v5967_v30 }
  0xbc   :  { %4854 = vmatpush3.bf16.msra.mxu1 %v7541_v2  ;;  %4832 = vmatprep.subr.bf16.mxu0 %v4831_v47  ;;  %v7568_v30 = vand.u32 4294901760, %v6006_v51  ;;  %v36_v51 = vld [vmem:[%s7268_s0 + $0x28] sm:$0xff] }
  0xbd   :  { %4856 = vmatprep.subr.bf16.mxu1 %v7542_v54  ;;  %v4875_v47 = vpack.c.bf16 %v7549_v32, %v7548_v49  ;;  %v122_v49 = vld [vmem:[#allocation2 + $0x298] sm:$0xff]  ;;  %v4883_v32 = vpack.c.bf16 %v7558_v63, %v7557_v3  ;;  %v4889_v3 = vpack.c.bf16 %v7564_v38, %v7563_v0 }
  0xbe   :  { %v1949_v60 = vand.u32 4294901760, %v122_v49 }
  0xbf   :  { %4834 = vmatpush3.bf16.msra.mxu0 %v4833_v62  ;;  %v7552_v62 = vld [vmem:[#allocation7_spill] sm:$0xff] }
  0xc0   :  { %4858 = vmatpush3.bf16.msra.mxu1 %v5976_v61  ;;  %4836 = vmatprep.subr.bf16.mxu0 %v4835_v36  ;;  %v4879_v36 = vpack.c.bf16 %v7554_v25, %v7553_v21  ;;  %v7562_v21 = vand.u32 4294901760, %v5955_v17  ;;  %v7567_v17 = vand.u32 4294901760, %v6004_v16  ;;  %v1898_v16 = vand.u32 4294901760, %v105_v26 }
  0xc1   :  { %4860 = vmatprep.subr.bf16.mxu1 %v7545_v48  ;;  %v6298_v38 = vsub.f32 %v122_v49, %v1949_v60  ;;  %v126_v49 = vld [vmem:[#allocation2 + $0x2b8] sm:$0xff] }
  0xc3   :  { %4838 = vmatpush3.bf16.msra.mxu0 %v4837_v45  ;;  %v120_v45 = vld [vmem:[#allocation2 + $0x288] sm:$0xff] }
  0xc4   :  { %4862 = vmatpush3.bf16.msra.mxu1 %v5998_v20  ;;  %4872 = vmatprep.subr.bf16.mxu0 %v4871_v23  ;;  %v104_v23 = vld [vmem:[#allocation2 + $0x208] sm:$0xff]  ;;  %v1943_v41 = vand.u32 4294901760, %v120_v45 }
  0xc5   :  { %4864 = vmatprep.subr.bf16.mxu1 %v6034_v55  ;;  %v1895_v12 = vand.u32 4294901760, %v104_v23 }
  0xc6   :  { %1506 = vmatmul.mubr.f32.vlgmr.msra.gmra.mrb[8].mxu0 %v6086_v46 }
  0xc7   :  { %4874 = vmatpush3.bf16.msra.mxu0 %v4873_v28  ;;  %1780 = vmatprep.mubr.f32.mxu0 %v7552_v62  ;;  %v121_v28 = vld [vmem:[#allocation2 + $0x290] sm:$0xff] }
  0xc8   :  { %4866 = vmatpush3.bf16.msra.mxu1 %v6115_v57  ;;  %4876 = vmatprep.subr.bf16.mxu0 %v4875_v47  ;;  %v1892_v47 = vand.u32 4294901760, %v103_v15  ;;  %v1946_v63 = vand.u32 4294901760, %v121_v28 }
  0xc9   :  { %4868 = vmatprep.subr.bf16.mxu1 %v6117_v22 }
  0xca   :  { %v6268_v46 = vsub.f32 %v103_v15, %v1892_v47  ;;  %v1955_v15 = vand.u32 4294901760, %v124_v10 }
  0xcb   :  { %4878 = vmatpush3.bf16.msra.mxu0 %v4877_v6  ;;  %v7561_v6 = vand.u32 4294901760, %v5937_v59  ;;  %v123_v59 = vld [vmem:[#allocation2 + $0x2a0] sm:$0xff] }
  0xcc   :  { %4870 = vmatpush3.bf16.msra.mxu1 %v6140_v50  ;;  %4880 = vmatprep.subr.bf16.mxu0 %v4879_v36  ;;  %v6241_v36 = vsub.f32 %v119_v43, %v1940_v52  ;;  %v6257_v43 = vpack.c.bf16 %v7568_v30, %v7567_v17  ;;  %v7364_v17 = vand.u32 4294901760, %v6298_v38 }
  0xcd   :  { %4904 = vmatprep.subr.bf16.mxu1 %v5829_v19  ;;  %v4887_v25 = vpack.c.bf16 %v7562_v21, %v7561_v6  ;;  %v7565_v19 = vand.u32 4294901760, %v7536_v42  ;;  %v7570_v42 = vand.u32 4294901760, %v6036_v24  ;;  %v6265_v6 = vsub.f32 %v120_v45, %v1943_v41 }
  0xce   :  { %v7572_v24 = vand.u32 4294901760, %v6072_v9  ;;  %v6296_v9 = vsub.f32 %v121_v28, %v1946_v63  ;;  %v7369_v28 = vand.u32 4294901760, %v6268_v46 }
  0xcf   :  { %v4891_v18 = vpack.c.bf16 %v7566_v14, %v7565_v19  ;;  %1614 = vmatmul.mubr.f32.vlgmr.msra.gmra.mrb[8].mxu1 %v1133_v4  ;;  %4882 = vmatpush3.bf16.msra.mxu0 %v4881_v39  ;;  %v6263_v35 = vpack.c.bf16 %v7570_v42, %v7569_v37  ;;  %v6270_v4 = vsub.f32 %v104_v23, %v1895_v12  ;;  %v1901_v39 = vand.u32 4294901760, %v106_v40 }
  0xd0   :  { %4906 = vmatpush3.bf16.msra.mxu1 %v7532_v31  ;;  %4884 = vmatprep.subr.bf16.mxu0 %v4883_v32  ;;  %v6280_v45 = vpack.c.bf16 %v7572_v24, %v7571_v34  ;;  %v1952_v31 = vand.u32 4294901760, %v123_v59  ;;  %v7374_v23 = vand.u32 4294901760, %v6241_v36  ;;  %v7573_v32 = vand.u32 4294901760, %v6081_v1  ;;  %v107_v1 = vld [vmem:[#allocation2 + $0x220] sm:$0xff] }
  0xd1   :  { %4908 = vmatprep.subr.bf16.mxu1 %v7533_v5  ;;  %1884 = vmatprep.mubr.f32.mxu1 %v7552_v62  ;;  %v7574_v5 = vand.u32 4294901760, %v6098_v58  ;;  %v6300_v62 = vpack.c.bf16 %v1943_v41, %v1940_v52  ;;  %v6302_v19 = vpack.c.bf16 %v1895_v12, %v1892_v47  ;;  %v7372_v11 = vand.u32 4294901760, %v6265_v6  ;;  %v125_v41 = vld [vmem:[#allocation2 + $0x2b0] sm:$0xff] }
  0xd2   :  { %v6288_v21 = vpack.c.bf16 %v7573_v32, %v1354_v44  ;;  %v108_v44 = vld [vmem:[#allocation2 + $0x228] sm:$0xff]  ;;  %v6305_v14 = vand.u32 4294901760, %v36_v51  ;;  %v6308_v58 = vpack.c.bf16 %v1949_v60, %v1946_v63  ;;  %v6310_v29 = vpack.c.bf16 %v1901_v39, %v1898_v16 }
  0xd3   :  { %v6294_v0 = vpack.c.bf16 %v7575_v8, %v7574_v5  ;;  %4886 = vmatpush3.bf16.msra.mxu0 %v4885_v7  ;;  %7576 = vst [vmem:[#allocation5_spill] sm:$0xff] %v6302_v19  ;;  %v7368_v52 = vand.u32 4294901760, %v6270_v4  ;;  %v6315_v47 = vsub.f32 %v105_v26, %v1898_v16  ;;  %v6317_v12 = vsub.f32 %v106_v40, %v1901_v39 }
  0xd4   :  { %7577 = vst [vmem:[#allocation6_spill] sm:$0xff] %v6305_v14  ;;  %4910 = vmatpush3.bf16.msra.mxu1 %v7535_v13  ;;  %4888 = vmatprep.subr.bf16.mxu0 %v4887_v25  ;;  %7578 = vst [vmem:[#allocation10_spill] sm:$0xff] %v6308_v58  ;;  %v6319_v7 = vpack.c.bf16 %v1955_v15, %v1952_v31  ;;  %v2119_v13 = vsub.f32 %v6241_v36, %v7374_v23  ;;  %v1904_v25 = vand.u32 4294901760, %v107_v1 }
  0xd5   :  { %7579 = vst [vmem:[#allocation15_spill] sm:$0xff] %v6310_v29  ;;  %4912 = vmatprep.subr.bf16.mxu1 %v7538_v33  ;;  %v1907_v63 = vand.u32 4294901760, %v108_v44  ;;  %v7365_v60 = vand.u32 4294901760, %v6296_v9  ;;  %v2126_v33 = vsub.f32 %v6265_v6, %v7372_v11  ;;  %v1958_v26 = vand.u32 4294901760, %v125_v41 }
  0xd6   :  { %7580 = vst [vmem:[#allocation16_spill] sm:$0xff] %v6319_v7  ;;  %v1961_v40 = vand.u32 4294901760, %v126_v49  ;;  %v6330_v30 = vsub.f32 %v36_v51, %v6305_v14  ;;  %v6333_v37 = vsub.f32 %v123_v59, %v1952_v31  ;;  %v2007_v42 = vsub.f32 %v6268_v46, %v7369_v28  ;;  %v109_v51 = vld [vmem:[#allocation2 + $0x230] sm:$0xff]  ;;  %v112_v28 = vld [vmem:[#allocation2 + $0x248] sm:$0xff] }
  0xd7   :  { %4890 = vmatpush3.bf16.msra.mxu0 %v4889_v3  ;;  %v2014_v3 = vsub.f32 %v6270_v4, %v7368_v52  ;;  %v6342_v16 = vsub.f32 %v124_v10, %v1955_v15  ;;  %v2120_v39 = vand.u32 4294901760, %v2119_v13  ;;  %v7367_v34 = vand.u32 4294901760, %v6315_v47  ;;  %v110_v10 = vld [vmem:[#allocation2 + $0x238] sm:$0xff] }
  0xd8   :  { %4914 = vmatpush3.bf16.msra.mxu1 %v7539_v56  ;;  %4892 = vmatprep.subr.bf16.mxu0 %v4891_v18  ;;  %v7366_v56 = vand.u32 4294901760, %v6317_v12  ;;  %v6346_v18 = vpack.c.bf16 %v1907_v63, %v1904_v25  ;;  %v6348_v59 = vsub.f32 %v107_v1, %v1904_v25  ;;  %v2133_v24 = vsub.f32 %v6296_v9, %v7365_v60  ;;  %v128_v60 = vld [vmem:[#allocation2 + $0x2c8] sm:$0xff] }
  0xd9   :  { %4916 = vmatprep.subr.bf16.mxu1 %v7540_v53  ;;  %v2140_v53 = vsub.f32 %v6298_v38, %v7364_v17  ;;  %v2127_v31 = vand.u32 4294901760, %v2126_v33  ;;  %v6357_v15 = vsub.f32 %v108_v44, %v1907_v63  ;;  %v6359_v32 = vpack.c.bf16 %v1961_v40, %v1958_v26  ;;  %v127_v17 = vld [vmem:[#allocation2 + $0x2c0] sm:$0xff] }
  0xda   :  { %7581 = vst [vmem:[#allocation8_spill] sm:$0xff] %v6346_v18  ;;  %v7375_v5 = vand.u32 4294901760, %v6330_v30  ;;  %v2008_v8 = vand.u32 4294901760, %v2007_v42  ;;  %v2015_v1 = vand.u32 4294901760, %v2014_v3  ;;  %v6364_v13 = vsub.f32 %v125_v41, %v1958_v26  ;;  %v111_v42 = vld [vmem:[#allocation2 + $0x240] sm:$0xff] }
  0xdb   :  { %4894 = vmatpush3.bf16.msra.mxu0 %v6257_v43  ;;  %7582 = vst [vmem:[#allocation9_spill] sm:$0xff] %v6359_v32  ;;  %v1910_v25 = vand.u32 4294901760, %v109_v51  ;;  %v6367_v43 = vsub.f32 %v126_v49, %v1961_v40  ;;  %v1913_v44 = vand.u32 4294901760, %v110_v10  ;;  %v2021_v63 = vsub.f32 %v6315_v47, %v7367_v34 }
  0xdc   :  { %4918 = vmatpush3.bf16.msra.mxu1 %v7541_v2  ;;  %4896 = vmatprep.subr.bf16.mxu0 %v6263_v35  ;;  %v2028_v2 = vsub.f32 %v6317_v12, %v7366_v56  ;;  %v2134_v35 = vand.u32 4294901760, %v2133_v24  ;;  %v2141_v33 = vand.u32 4294901760, %v2140_v53  ;;  %v7371_v41 = vand.u32 4294901760, %v6333_v37 }
  0xdd   :  { %4920 = vmatprep.subr.bf16.mxu1 %v7542_v54  ;;  %v7370_v26 = vand.u32 4294901760, %v6342_v16  ;;  %v6378_v54 = vpack.c.bf16 %v2127_v31, %v2120_v39  ;;  %v1964_v49 = vand.u32 4294901760, %v127_v17  ;;  %v1967_v40 = vand.u32 4294901760, %v128_v60 }
  0xde   :  { %v1990_v3 = vsub.f32 %v6330_v30, %v7375_v5  ;;  %v6385_v24 = vpack.c.bf16 %v2015_v1, %v2008_v8  ;;  %v6387_v53 = vsub.f32 %v109_v51, %v1910_v25  ;;  %v7373_v56 = vand.u32 4294901760, %v6348_v59  ;;  %v130_v1 = vld [vmem:[#allocation2 + $0x2d8] sm:$0xff] }
  0xdf   :  { %4898 = vmatpush3.bf16.msra.mxu0 %v6280_v45  ;;  %v7376_v45 = vand.u32 4294901760, %v6357_v15  ;;  %v6392_v39 = vpack.c.bf16 %v1913_v44, %v1910_v25  ;;  %v6394_v31 = vsub.f32 %v110_v10, %v1913_v44  ;;  %v2022_v34 = vand.u32 4294901760, %v2021_v63  ;;  %v129_v10 = vld [vmem:[#allocation2 + $0x2d0] sm:$0xff]  ;;  %v114_v5 = vld [vmem:[#allocation2 + $0x258] sm:$0xff] }
  0xe0   :  { %4922 = vmatpush3.bf16.msra.mxu1 %v5976_v61  ;;  %4900 = vmatprep.subr.bf16.mxu0 %v6288_v21  ;;  %v2029_v52 = vand.u32 4294901760, %v2028_v2  ;;  %v6396_v61 = vpack.c.bf16 %v2141_v33, %v2134_v35  ;;  %v2147_v21 = vsub.f32 %v6333_v37, %v7371_v41  ;;  %v2154_v51 = vsub.f32 %v6342_v16, %v7370_v26 }
  0xe1   :  { %4924 = vmatprep.subr.bf16.mxu1 %v7545_v48  ;;  %7583 = vst [vmem:[#allocation11_spill] sm:$0xff] %v6392_v39  ;;  %v1916_v8 = vand.u32 4294901760, %v111_v42  ;;  %v6405_v48 = vpack.c.bf16 %v1967_v40, %v1964_v49  ;;  %v7378_v25 = vand.u32 4294901760, %v6364_v13  ;;  %v7377_v44 = vand.u32 4294901760, %v6367_v43 }
  0xe2   :  { %v1991_v63 = vand.u32 4294901760, %v1990_v3  ;;  %v6411_v2 = vsub.f32 %v127_v17, %v1964_v49  ;;  %v1919_v35 = vand.u32 4294901760, %v112_v28  ;;  %v2042_v33 = vsub.f32 %v6357_v15, %v7376_v45 }
  0xe3   :  { %4902 = vmatpush3.bf16.msra.mxu0 %v6294_v0  ;;  %7584 = vst [vmem:[#allocation12_spill] sm:$0xff] %v6405_v48  ;;  %v2035_v0 = vsub.f32 %v6348_v59, %v7373_v56  ;;  %v6420_v26 = vpack.c.bf16 %v2029_v52, %v2022_v34  ;;  %v6422_v3 = vsub.f32 %v128_v60, %v1967_v40  ;;  %v7381_v41 = vand.u32 4294901760, %v6387_v53 }
  0xe4   :  { %4926 = vmatpush3.bf16.msra.mxu1 %v5998_v20  ;;  %4936 = vmatprep.subr.bf16.mxu0 %v6300_v62  ;;  %v113_v20 = vld [vmem:[#allocation2 + $0x250] sm:$0xff]  ;;  %v7384_v17 = vand.u32 4294901760, %v6394_v31  ;;  %v2148_v49 = vand.u32 4294901760, %v2147_v21  ;;  %v2155_v11 = vand.u32 4294901760, %v2154_v51  ;;  %v1970_v56 = vand.u32 4294901760, %v129_v10 }
  0xe5   :  { %4928 = vmatprep.subr.bf16.mxu1 %v6034_v55  ;;  %v1973_v23 = vand.u32 4294901760, %v130_v1  ;;  %v6428_v45 = vsub.f32 %v111_v42, %v1916_v8  ;;  %v2161_v55 = vsub.f32 %v6364_v13, %v7378_v25  ;;  %v2168_v52 = vsub.f32 %v6367_v43, %v7377_v44  ;;  %v131_v44 = vld [vmem:[#allocation2 + $0x2e0] sm:$0xff] }
  0xe6   :  { %1782 = vmatmul.mubr.f32.vlgmr.msra.gmra.mrb[10].mxu0 %v6058_v27  ;;  %v6438_v60 = vpack.c.bf16 %v1919_v35, %v1916_v8  ;;  %v2036_v34 = vand.u32 4294901760, %v2035_v0  ;;  %v2043_v40 = vand.u32 4294901760, %v2042_v33  ;;  %v1922_v21 = vand.u32 4294901760, %v113_v20  ;;  %v6466_v25 = vld [vmem:[#allocation2 + $0x260] sm:$0xff] }
  0xe7   :  { %4938 = vmatpush3.bf16.msra.mxu0 %v6302_v19  ;;  %1992 = vmatprep.mubr.f32.mxu0 %v1991_v63  ;;  %v1925_v42 = vand.u32 4294901760, %v114_v5  ;;  %v2049_v51 = vsub.f32 %v6387_v53, %v7381_v41  ;;  %v2056_v63 = vsub.f32 %v6394_v31, %v7384_v17  ;;  %v6448_v8 = vpack.c.bf16 %v2155_v11, %v2148_v49 }
  0xe8   :  { %4930 = vmatpush3.bf16.msra.mxu1 %v6115_v57  ;;  %4940 = vmatprep.subr.bf16.mxu0 %v6308_v58  ;;  %v132_v57 = vld [vmem:[#allocation2 + $0x2e8] sm:$0xff]  ;;  %v6450_v0 = vsub.f32 %v112_v28, %v1919_v35  ;;  %v6452_v33 = vpack.c.bf16 %v1973_v23, %v1970_v56  ;;  %v6456_v58 = vsub.f32 %v129_v10, %v1970_v56  ;;  %v2162_v19 = vand.u32 4294901760, %v2161_v55 }
  0xe9   :  { %4932 = vmatprep.subr.bf16.mxu1 %v6117_v22  ;;  %v7385_v22 = vand.u32 4294901760, %v6422_v3  ;;  %v6458_v41 = vsub.f32 %v130_v1, %v1973_v23  ;;  %v2169_v17 = vand.u32 4294901760, %v2168_v52  ;;  %v6462_v11 = vpack.c.bf16 %v2043_v40, %v2036_v34  ;;  %v6474_v55 = vld [vmem:[#allocation2 + $0x268] sm:$0xff]  ;;  %v6483_v40 = vld [vmem:[#allocation2 + $0x2f0] sm:$0xff] }
  0xea   :  { %7585 = vst [vmem:[#allocation13_spill] sm:$0xff] %v6456_v58  ;;  %v6464_v28 = vsub.f32 %v113_v20, %v1922_v21  ;;  %v1976_v35 = vand.u32 4294901760, %v131_v44  ;;  %v1979_v49 = vand.u32 4294901760, %v132_v57  ;;  %v6469_v56 = vpack.c.bf16 %v1925_v42, %v1922_v21  ;;  %v6485_v21 = vld [vmem:[#allocation2 + $0x2f8] sm:$0xff] }
  0xeb   :  { %4942 = vmatpush3.bf16.msra.mxu0 %v6310_v29  ;;  %7586 = vst [vmem:[#allocation14_spill] sm:$0xff] %v6458_v41  ;;  %v2050_v23 = vand.u32 4294901760, %v2049_v51  ;;  %v2057_v10 = vand.u32 4294901760, %v2056_v63  ;;  %v7587_v1 = vand.u32 4294901760, %v6411_v2  ;;  %v6476_v52 = vsub.f32 %v114_v5, %v1925_v42 }
  0xec   :  { %4934 = vmatpush3.bf16.msra.mxu1 %v6140_v50  ;;  %4944 = vmatprep.subr.bf16.mxu0 %v6319_v7  ;;  %v2182_v20 = vsub.f32 %v6422_v3, %v7385_v22  ;;  %v4979_v51 = vpack.c.bf16 %v2169_v17, %v2162_v19  ;;  %v1928_v5 = vand.u32 4294901760, %v6466_v25  ;;  %v6497_v22 = vpack.c.bf16 %v1979_v49, %v1976_v35 }
  0xed   :  { %4968 = vmatprep.subr.bf16.mxu1 %v6378_v54  ;;  %v2175_v50 = vsub.f32 %v6411_v2, %v7587_v1  ;;  %v35_v1 = vld [vmem:[%s7268_s0 + $0x20] sm:$0xff]  ;;  %v6501_v54 = vsub.f32 %v132_v57, %v1979_v49  ;;  %v1931_v19 = vand.u32 4294901760, %v6474_v55  ;;  %v4981_v17 = vpack.c.bf16 %v2057_v10, %v2050_v23 }
  0xee   :  { %v1982_v42 = vand.u32 4294901760, %v6483_v40  ;;  %v1985_v34 = vand.u32 4294901760, %v6485_v21  ;;  %v7588_v57 = vand.u32 4294901760, %v6428_v45  ;;  %v7589_v49 = vand.u32 4294901760, %v6450_v0 }
  0xef   :  { %1886 = vmatmul.mubr.f32.vlgmr.msra.gmra.mrb[10].mxu1 %v6058_v27  ;;  %4946 = vmatpush3.bf16.msra.mxu0 %v6346_v18  ;;  %v6499_v27 = vsub.f32 %v131_v44, %v1976_v35  ;;  %v2176_v63 = vand.u32 4294901760, %v2175_v50  ;;  %v6507_v18 = vld [vmem:[#allocation2 + $0x270] sm:$0xff]  ;;  %v2183_v44 = vand.u32 4294901760, %v2182_v20  ;;  %v6518_v23 = vand.u32 4294901760, %v35_v1 }
  0xf0   :  { %4970 = vmatpush3.bf16.msra.mxu1 %v6385_v24  ;;  %4948 = vmatprep.subr.bf16.mxu0 %v6359_v32  ;;  %v6509_v24 = vld [vmem:[#allocation2 + $0x278] sm:$0xff]  ;;  %v2063_v35 = vsub.f32 %v6428_v45, %v7588_v57  ;;  %v7590_v10 = vand.u32 4294901760, %v6456_v58  ;;  %v7591_v32 = vand.u32 4294901760, %v6458_v41  ;;  %v6544_v57 = vsub.f32 %v6485_v21, %v1985_v34 }
  0xf1   :  { %4972 = vmatprep.subr.bf16.mxu1 %v6396_v61  ;;  %2228 = vmatprep.mubr.f32.mxu1 %v6305_v14  ;;  %v2070_v61 = vsub.f32 %v6450_v0, %v7589_v49  ;;  %v6532_v49 = vsub.f32 %v6466_v25, %v1928_v5  ;;  %v1937_v7 = vand.u32 4294901760, %v6509_v24  ;;  %v7404_v25 = vand.u32 4294901760, %v6501_v54 }
  0xf2   :  { %v2189_v50 = vsub.f32 %v6456_v58, %v7590_v10  ;;  %v2196_v20 = vsub.f32 %v6458_v41, %v7591_v32  ;;  %v1934_v10 = vand.u32 4294901760, %v6507_v18  ;;  %v6541_v32 = vsub.f32 %v6483_v40, %v1982_v42 }
  0xf3   :  { %4950 = vmatpush3.bf16.msra.mxu0 %v6392_v39  ;;  %v6535_v39 = vsub.f32 %v6474_v55, %v1931_v19  ;;  %v4983_v14 = vpack.c.bf16 %v2183_v44, %v2176_v63  ;;  %v2071_v55 = vand.u32 4294901760, %v2070_v61  ;;  %v6549_v41 = vsub.f32 %v35_v1, %v6518_v23 }
  0xf4   :  { %4974 = vmatpush3.bf16.msra.mxu1 %v6420_v26  ;;  %4952 = vmatprep.subr.bf16.mxu0 %v6405_v48  ;;  %v2064_v48 = vand.u32 4294901760, %v2063_v35  ;;  %v2190_v58 = vand.u32 4294901760, %v2189_v50  ;;  %v7592_v40 = vand.u32 4294901760, %v6464_v28  ;;  %v7593_v21 = vand.u32 4294901760, %v6476_v52 }
  0xf5   :  { %4976 = vmatprep.subr.bf16.mxu1 %v6448_v8  ;;  %v2197_v8 = vand.u32 4294901760, %v2196_v20  ;;  %v6561_v63 = vsub.f32 %v6507_v18, %v1934_v10  ;;  %v6564_v1 = vsub.f32 %v6509_v24, %v1937_v7  ;;  %v7594_v61 = vand.u32 4294901760, %v6499_v27 }
  0xf6   :  { %v2077_v29 = vsub.f32 %v6464_v28, %v7592_v40  ;;  %v2084_v26 = vsub.f32 %v6476_v52, %v7593_v21  ;;  %v7406_v18 = vand.u32 4294901760, %v6544_v57  ;;  %v6576_v40 = vpack.c.bf16 %v1931_v19, %v1928_v5 }
  0xf7   :  { %4954 = vmatpush3.bf16.msra.mxu0 %v6438_v60  ;;  %v2203_v50 = vsub.f32 %v6499_v27, %v7594_v61  ;;  %v6578_v24 = vpack.c.bf16 %v1985_v34, %v1982_v42  ;;  %v7408_v21 = vand.u32 4294901760, %v6549_v41  ;;  %v4987_v35 = vpack.c.bf16 %v2197_v8, %v2190_v58 }
  0xf8   :  { %4978 = vmatpush3.bf16.msra.mxu1 %v6462_v11  ;;  %4956 = vmatprep.subr.bf16.mxu0 %v6452_v33  ;;  %v2210_v11 = vsub.f32 %v6501_v54, %v7404_v25  ;;  %v2078_v44 = vand.u32 4294901760, %v2077_v29  ;;  %v2085_v61 = vand.u32 4294901760, %v2084_v26  ;;  %v7595_v25 = vand.u32 4294901760, %v6532_v49 }
  0xf9   :  { %4980 = vmatprep.subr.bf16.mxu1 %v4979_v51  ;;  %v4985_v51 = vpack.c.bf16 %v2071_v55, %v2064_v48  ;;  %v7596_v5 = vand.u32 4294901760, %v6535_v39  ;;  %v7405_v42 = vand.u32 4294901760, %v6561_v63  ;;  %v7407_v19 = vand.u32 4294901760, %v6564_v1 }
  0xfa   :  { %v2091_v20 = vsub.f32 %v6532_v49, %v7595_v25  ;;  %v2204_v48 = vand.u32 4294901760, %v2203_v50  ;;  %v2211_v58 = vand.u32 4294901760, %v2210_v11  ;;  %v7597_v29 = vand.u32 4294901760, %v6541_v32 }
  0xfb   :  { %4958 = vmatpush3.bf16.msra.mxu0 %v6469_v56  ;;  %v2098_v34 = vsub.f32 %v6535_v39, %v7596_v5  ;;  %v2224_v26 = vsub.f32 %v6544_v57, %v7406_v18  ;;  %v1996_v25 = vsub.f32 %v6549_v41, %v7408_v21  ;;  %v6601_v55 = vpack.c.bf16 %v1937_v7, %v1934_v10  ;;  %v6676_v21 = vld [vmem:[#allocation2 + $0x300] sm:$0xff] }
  0xfc   :  { %4982 = vmatpush3.bf16.msra.mxu1 %v4981_v17  ;;  %4960 = vmatprep.subr.bf16.mxu0 %v6497_v22  ;;  %v2217_v17 = vsub.f32 %v6541_v32, %v7597_v29  ;;  %v4989_v8 = vpack.c.bf16 %v2085_v61, %v2078_v44  ;;  %v2092_v50 = vand.u32 4294901760, %v2091_v20  ;;  %v2105_v5 = vsub.f32 %v6561_v63, %v7405_v42 }
  0xfd   :  { %4984 = vmatprep.subr.bf16.mxu1 %v4983_v14  ;;  %v4999_v14 = vpack.c.bf16 %v6265_v6, %v6241_v36  ;;  %v2099_v11 = vand.u32 4294901760, %v2098_v34  ;;  %v2112_v29 = vsub.f32 %v6564_v1, %v7407_v19  ;;  %v4991_v7 = vpack.c.bf16 %v2211_v58, %v2204_v48 }
  0xfe   :  { %v2218_v10 = vand.u32 4294901760, %v2217_v17  ;;  %v2225_v44 = vand.u32 4294901760, %v2224_v26  ;;  %v1997_v61 = vand.u32 4294901760, %v1996_v25  ;;  %v5003_v34 = vpack.c.bf16 %v6298_v38, %v6296_v9  ;;  %v7599_v25 = vld [vmem:[#allocation10_spill] sm:$0xff] }
  0xff   :  { %4962 = vmatpush3.bf16.msra.mxu0 %v6576_v40  ;;  %v4993_v20 = vpack.c.bf16 %v2099_v11, %v2092_v50  ;;  %v2106_v42 = vand.u32 4294901760, %v2105_v5  ;;  %v2113_v18 = vand.u32 4294901760, %v2112_v29  ;;  %v5007_v58 = vpack.c.bf16 %v6342_v16, %v6333_v37  ;;  %v7601_v50 = vld [vmem:[#allocation15_spill] sm:$0xff]  ;;  %v7602_v11 = vld [vmem:[#allocation13_spill] sm:$0xff]  ;;  %v7603_v5 = vld [vmem:[#allocation14_spill] sm:$0xff] }
 0x100   :  { %4986 = vmatpush3.bf16.msra.mxu1 %v4985_v51  ;;  %4964 = vmatprep.subr.bf16.mxu0 %v6578_v24  ;;  %v5001_v51 = vpack.c.bf16 %v6270_v4, %v6268_v46  ;;  %v4995_v19 = vpack.c.bf16 %v2225_v44, %v2218_v10  ;;  %v5009_v17 = vpack.c.bf16 %v6357_v15, %v6348_v59  ;;  %v7605_v44 = vld [vmem:[#allocation8_spill] sm:$0xff] }
 0x101   :  { %4988 = vmatprep.subr.bf16.mxu1 %v4987_v35  ;;  %v5005_v35 = vpack.c.bf16 %v6317_v12, %v6315_v47  ;;  %v4997_v48 = vpack.c.bf16 %v2113_v18, %v2106_v42  ;;  %v5011_v26 = vpack.c.bf16 %v6367_v43, %v6364_v13  ;;  %v5013_v18 = vpack.c.bf16 %v6394_v31, %v6387_v53  ;;  %v7598_v42 = vld [vmem:[#allocation5_spill] sm:$0xff] }
 0x102   :  { %v5019_v29 = vpack.c.bf16 %v7603_v5, %v7602_v11  ;;  %v5021_v10 = vpack.c.bf16 %v6476_v52, %v6464_v28 }
 0x103   :  { %4966 = vmatpush3.bf16.msra.mxu0 %v6601_v55 }
 0x104   :  { %4990 = vmatpush3.bf16.msra.mxu1 %v4989_v8  ;;  %5000 = vmatprep.subr.bf16.mxu0 %v4999_v14  ;;  %v7600_v8 = vand.u32 4294901760, %v6330_v30  ;;  %v5017_v14 = vpack.c.bf16 %v6450_v0, %v6428_v45 }
 0x105   :  { %4992 = vmatprep.subr.bf16.mxu1 %v4991_v7  ;;  %v7604_v7 = vld [vmem:[#allocation16_spill] sm:$0xff] }
 0x106   :  { %1998 = vmatmul.mubr.f32.vlgmr.msra.gmra.mrb[12].mxu0 %v1997_v61  ;;  %v7606_v61 = vld [vmem:[#allocation9_spill] sm:$0xff] }
 0x107   :  { %5002 = vmatpush3.bf16.msra.mxu0 %v5001_v51  ;;  %2365 = vmatprep.mubr.f32.mxu0 %v6330_v30  ;;  %v5023_v30 = vpack.c.bf16 %v6501_v54, %v6499_v27 }
 0x108   :  { %4994 = vmatpush3.bf16.msra.mxu1 %v4993_v20  ;;  %5004 = vmatprep.subr.bf16.mxu0 %v5003_v34  ;;  %v5025_v34 = vpack.c.bf16 %v6535_v39, %v6532_v49 }
 0x109   :  { %4996 = vmatprep.subr.bf16.mxu1 %v4995_v19  ;;  %v5015_v19 = vpack.c.bf16 %v6422_v3, %v6411_v2 }
 0x10b   :  { %5006 = vmatpush3.bf16.msra.mxu0 %v5005_v35 }
 0x10c   :  { %4998 = vmatpush3.bf16.msra.mxu1 %v4997_v48  ;;  %5008 = vmatprep.subr.bf16.mxu0 %v5007_v58  ;;  %v7607_v48 = vld [vmem:[#allocation11_spill] sm:$0xff]  ;;  %v5027_v58 = vpack.c.bf16 %v6544_v57, %v6541_v32 }
 0x10d   :  { %5032 = vmatprep.subr.bf16.mxu1 %v6300_v62 }
 0x10f   :  { %2230 = vmatmul.mubr.f32.vlgmr.msra.gmra.mrb[12].mxu1 %v6518_v23  ;;  %5010 = vmatpush3.bf16.msra.mxu0 %v5009_v17  ;;  %v7608_v17 = vld [vmem:[#allocation12_spill] sm:$0xff] }
 0x110   :  { %5034 = vmatpush3.bf16.msra.mxu1 %v7598_v42  ;;  %5012 = vmatprep.subr.bf16.mxu0 %v5011_v26  ;;  %v5029_v26 = vpack.c.bf16 %v6564_v1, %v6561_v63 }
 0x111   :  { %5036 = vmatprep.subr.bf16.mxu1 %v7599_v25  ;;  %2472 = vmatprep.mubr.f32.mxu1 %v7600_v8 }
 0x113   :  { %5014 = vmatpush3.bf16.msra.mxu0 %v5013_v18  ;;  %v7609_v18 = vand.u32 4294901760, %v6241_v36  ;;  %v7613_v36 = vand.u32 4294901760, %v6296_v9  ;;  %v7615_v9 = vand.u32 4294901760, %v6315_v47 }
 0x114   :  { %5038 = vmatpush3.bf16.msra.mxu1 %v7601_v50  ;;  %5016 = vmatprep.subr.bf16.mxu0 %v5015_v19  ;;  %v7610_v19 = vand.u32 4294901760, %v6265_v6  ;;  %v7614_v6 = vand.u32 4294901760, %v6298_v38  ;;  %v7616_v38 = vand.u32 4294901760, %v6317_v12 }
 0x115   :  { %5040 = vmatprep.subr.bf16.mxu1 %v7604_v7 }
 0x116   :  { %v5063_v8 = vpack.c.bf16 %v7610_v19, %v7609_v18  ;;  %v5067_v18 = vpack.c.bf16 %v7614_v6, %v7613_v36  ;;  %v7621_v36 = vand.u32 4294901760, %v6357_v15 }
 0x117   :  { %5018 = vmatpush3.bf16.msra.mxu0 %v5017_v14  ;;  %v6662_v14 = vld [vmem:[#allocation2 + $0x380] sm:$0xff] }
 0x118   :  { %5042 = vmatpush3.bf16.msra.mxu1 %v7605_v44  ;;  %5020 = vmatprep.subr.bf16.mxu0 %v5019_v29  ;;  %v7412_v19 = vand.u32 4294901760, %v6662_v14 }
 0x119   :  { %5044 = vmatprep.subr.bf16.mxu1 %v7606_v61  ;;  %v3743_v51 = vpop.f32.mrb[0].mxu0 }
 0x11a   :  { %v3744_v20 = vpop.f32.mrb[1].mxu0 }
 0x11b   :  { %5022 = vmatpush3.bf16.msra.mxu0 %v5021_v10  ;;  %v3745_v35 = vadd.f32 %v3744_v20, %v3743_v51  ;;  %v6664_v10 = vld [vmem:[#allocation2 + $0x388] sm:$0xff]  ;;  %v7611_v51 = vand.u32 4294901760, %v6268_v46  ;;  %v7612_v20 = vand.u32 4294901760, %v6270_v4 }
 0x11c   :  { %5046 = vmatpush3.bf16.msra.mxu1 %v7607_v48  ;;  %5024 = vmatprep.subr.bf16.mxu0 %v5023_v30  ;;  %v7411_v46 = vand.u32 4294901760, %v6664_v10 }
 0x11d   :  { %5048 = vmatprep.subr.bf16.mxu1 %v7608_v17 }
 0x11e   :  { %v6706_v12 = vsub.f32 %v6664_v10, %v7411_v46 }
 0x11f   :  { %5026 = vmatpush3.bf16.msra.mxu0 %v5025_v34  ;;  %v5065_v34 = vpack.c.bf16 %v7612_v20, %v7611_v51  ;;  %v7618_v51 = vand.u32 4294901760, %v6333_v37  ;;  %v6710_v37 = vld [vmem:[#allocation2 + $0x398] sm:$0xff] }
 0x120   :  { %5050 = vmatpush3.bf16.msra.mxu1 %v6438_v60  ;;  %5028 = vmatprep.subr.bf16.mxu0 %v5027_v58 }
 0x121   :  { %5052 = vmatprep.subr.bf16.mxu1 %v6452_v33 }
 0x122   :  { %v3778_v29 = vpop.f32.mrb[0].mxu1 }
 0x123   :  { %v3779_v30 = vpop.f32.mrb[1].mxu1  ;;  %5030 = vmatpush3.bf16.msra.mxu0 %v5029_v26  ;;  %v6680_v26 = vld [vmem:[#allocation2 + $0x308] sm:$0xff] }
 0x124   :  { %v3780_v58 = vadd.f32 %v3779_v30, %v3778_v29  ;;  %5054 = vmatpush3.bf16.msra.mxu1 %v6469_v56  ;;  %5064 = vmatprep.subr.bf16.mxu0 %v5063_v8  ;;  %v5069_v8 = vpack.c.bf16 %v7616_v38, %v7615_v9  ;;  %v7617_v29 = vld [vmem:[#allocation6_spill] sm:$0xff]  ;;  %v7410_v30 = vand.u32 4294901760, %v6676_v21  ;;  %v7409_v47 = vand.u32 4294901760, %v6680_v26  ;;  %v137_v9 = vld [vmem:[#allocation2 + $0x310] sm:$0xff] }
 0x125   :  { %5056 = vmatprep.subr.bf16.mxu1 %v6497_v22  ;;  %v7622_v38 = vand.u32 4294901760, %v6364_v13  ;;  %v7624_v13 = vand.u32 4294901760, %v6387_v53  ;;  %v2760_v46 = vand.u32 4294901760, %v137_v9  ;;  %v7631_v53 = vand.u32 4294901760, %v7602_v11  ;;  %v156_v11 = vld [vmem:[#allocation2 + $0x3a8] sm:$0xff] }
 0x126   :  { %v6682_v4 = vadd.f32 %v3780_v58, %v3745_v35  ;;  %2368 = vmatmul.mubr.f32.vlgmr.msra.gmra.mrb[14].mxu0 %v6549_v41  ;;  %v7619_v35 = vand.u32 4294901760, %v6342_v16  ;;  %v6708_v58 = vld [vmem:[#allocation2 + $0x390] sm:$0xff]  ;;  %v7620_v16 = vand.u32 4294901760, %v6348_v59  ;;  %v6729_v59 = vsub.f32 %v6680_v26, %v7409_v47 }
 0x127   :  { %5066 = vmatpush3.bf16.msra.mxu0 %v5065_v34  ;;  %2642 = vmatprep.mubr.f32.mxu0 %v7617_v29  ;;  %v6699_v34 = vsub.f32 %v6662_v14, %v7412_v19  ;;  %v2808_v15 = vand.u32 4294901760, %v6708_v58  ;;  %v7627_v47 = vand.u32 4294901760, %v6422_v3  ;;  %v7628_v19 = vand.u32 4294901760, %v6549_v41 }
 0x128   :  { %5058 = vmatpush3.bf16.msra.mxu1 %v6576_v40  ;;  %5068 = vmatprep.subr.bf16.mxu0 %v5067_v18  ;;  %v5071_v20 = vpack.c.bf16 %v7619_v35, %v7618_v51  ;;  %v5073_v6 = vpack.c.bf16 %v7621_v36, %v7620_v16  ;;  %v6719_v18 = vsub.f32 %v6676_v21, %v7410_v30  ;;  %v7623_v51 = vand.u32 4294901760, %v6367_v43  ;;  %v138_v36 = vld [vmem:[#allocation2 + $0x318] sm:$0xff] }
 0x129   :  { %5060 = vmatprep.subr.bf16.mxu1 %v6578_v24  ;;  %v2811_v16 = vand.u32 4294901760, %v6710_v37  ;;  %v7625_v43 = vand.u32 4294901760, %v6394_v31  ;;  %v7632_v31 = vand.u32 4294901760, %v7603_v5  ;;  %v7634_v3 = vand.u32 4294901760, %v6476_v52  ;;  %v38_v52 = vld [vmem:[%s7268_s0 + $0x38] sm:$0xff] }
 0x12a   :  { %v5075_v35 = vpack.c.bf16 %v7623_v51, %v7622_v38  ;;  %v7626_v51 = vand.u32 4294901760, %v6411_v2  ;;  %v7633_v2 = vand.u32 4294901760, %v6464_v28  ;;  %v7422_v41 = vand.u32 4294901760, %v6719_v18 }
 0x12b   :  { %5070 = vmatpush3.bf16.msra.mxu0 %v5069_v8  ;;  %v5077_v38 = vpack.c.bf16 %v7625_v43, %v7624_v13  ;;  %v7630_v8 = vand.u32 4294901760, %v6450_v0  ;;  %v5083_v13 = vpack.c.bf16 %v7632_v31, %v7631_v53  ;;  %v2763_v0 = vand.u32 4294901760, %v138_v36 }
 0x12c   :  { %5062 = vmatpush3.bf16.msra.mxu1 %v6601_v55  ;;  %5072 = vmatprep.subr.bf16.mxu0 %v5071_v20  ;;  %v5079_v30 = vpack.c.bf16 %v7627_v47, %v7626_v51  ;;  %v6758_v47 = vpack.c.bf16 %v7634_v3, %v7633_v2  ;;  %v7635_v5 = vand.u32 4294901760, %v6699_v34  ;;  %v7413_v28 = vand.u32 4294901760, %v6729_v59 }
 0x12d   :  { %5096 = vmatprep.subr.bf16.mxu1 %v6300_v62  ;;  %v7629_v62 = vand.u32 4294901760, %v6428_v45  ;;  %v6763_v45 = vsub.f32 %v6708_v58, %v2808_v15  ;;  %v7637_v58 = vand.u32 4294901760, %v6501_v54  ;;  %v7638_v43 = vand.u32 4294901760, %v6706_v12 }
 0x12e   :  { %v7640_v53 = vand.u32 4294901760, %v6535_v39  ;;  %v7642_v54 = vand.u32 4294901760, %v6544_v57  ;;  %v6804_v3 = vsub.f32 %v137_v9, %v2760_v46  ;;  %v6809_v57 = vand.u32 4294901760, %v38_v52 }
 0x12f   :  { %2476 = vmatmul.mubr.f32.vlgmr.msra.gmra.mrb[14].mxu1 %v7628_v19  ;;  %5074 = vmatpush3.bf16.msra.mxu0 %v5073_v6  ;;  %v5081_v20 = vpack.c.bf16 %v7630_v8, %v7629_v62  ;;  %v155_v19 = vld [vmem:[#allocation2 + $0x3a0] sm:$0xff]  ;;  %v2981_v6 = vsub.f32 %v6699_v34, %v7635_v5  ;;  %v6780_v8 = vsub.f32 %v6710_v37, %v2811_v16  ;;  %v7639_v62 = vand.u32 4294901760, %v6532_v49  ;;  %v140_v49 = vld [vmem:[#allocation2 + $0x328] sm:$0xff] }
 0x130   :  { %5098 = vmatpush3.bf16.msra.mxu1 %v7598_v42  ;;  %5076 = vmatprep.subr.bf16.mxu0 %v5075_v35  ;;  %v7636_v42 = vand.u32 4294901760, %v6499_v27  ;;  %v2988_v51 = vsub.f32 %v6706_v12, %v7638_v43  ;;  %v7641_v27 = vand.u32 4294901760, %v6541_v32  ;;  %v7643_v37 = vand.u32 4294901760, %v6561_v63  ;;  %v139_v5 = vld [vmem:[#allocation2 + $0x320] sm:$0xff]  ;;  %7645 = vst [vmem:[#allocation7_spill] sm:$0xff] %v6809_v57 }
 0x131   :  { %5100 = vmatprep.subr.bf16.mxu1 %v7599_v25  ;;  %2746 = vmatprep.mubr.f32.mxu1 %v7617_v29  ;;  %v6790_v25 = vpack.c.bf16 %v7640_v53, %v7639_v62  ;;  %v7644_v29 = vand.u32 4294901760, %v6564_v1  ;;  %v2814_v39 = vand.u32 4294901760, %v155_v19  ;;  %v2869_v32 = vsub.f32 %v6719_v18, %v7422_v41 }
 0x132   :  { %v6777_v35 = vpack.c.bf16 %v7637_v58, %v7636_v42  ;;  %v6796_v31 = vpack.c.bf16 %v7642_v54, %v7641_v27  ;;  %v2817_v42 = vand.u32 4294901760, %v156_v11  ;;  %v6812_v63 = vsub.f32 %v138_v36, %v2763_v0 }
 0x133   :  { %v6802_v2 = vpack.c.bf16 %v7644_v29, %v7643_v37  ;;  %5078 = vmatpush3.bf16.msra.mxu0 %v5077_v38  ;;  %v2982_v1 = vand.u32 4294901760, %v2981_v6  ;;  %v2876_v9 = vsub.f32 %v6729_v59, %v7413_v28  ;;  %v7417_v38 = vand.u32 4294901760, %v6763_v45  ;;  %v157_v28 = vld [vmem:[#allocation2 + $0x3b0] sm:$0xff] }
 0x134   :  { %5102 = vmatpush3.bf16.msra.mxu1 %v7601_v50  ;;  %5080 = vmatprep.subr.bf16.mxu0 %v5079_v30  ;;  %v2989_v58 = vand.u32 4294901760, %v2988_v51  ;;  %v2766_v43 = vand.u32 4294901760, %v139_v5  ;;  %v2769_v62 = vand.u32 4294901760, %v140_v49  ;;  %v7414_v53 = vand.u32 4294901760, %v6780_v8 }
 0x135   :  { %5104 = vmatprep.subr.bf16.mxu1 %v7604_v7  ;;  %v7646_v27 = vand.u32 4294901760, %v6662_v14  ;;  %v7647_v50 = vand.u32 4294901760, %v6664_v10  ;;  %v7649_v36 = vand.u32 4294901760, %v6676_v21  ;;  %v7650_v6 = vand.u32 4294901760, %v6680_v26  ;;  %v158_v10 = vld [vmem:[#allocation2 + $0x3b8] sm:$0xff]  ;;  %v141_v26 = vld [vmem:[#allocation2 + $0x330] sm:$0xff] }
 0x136   :  { %v6832_v37 = vpack.c.bf16 %v2811_v16, %v2808_v15  ;;  %v6834_v7 = vpack.c.bf16 %v2763_v0, %v2760_v46  ;;  %v6836_v51 = vpack.c.bf16 %v2817_v42, %v2814_v39  ;;  %v6838_v29 = vsub.f32 %v155_v19, %v2814_v39  ;;  %v142_v15 = vld [vmem:[#allocation2 + $0x338] sm:$0xff] }
 0x137   :  { %v6824_v30 = vpack.c.bf16 %v7647_v50, %v7646_v27  ;;  %v6830_v54 = vpack.c.bf16 %v7650_v6, %v7649_v36  ;;  %5082 = vmatpush3.bf16.msra.mxu0 %v5081_v20  ;;  %v2870_v14 = vand.u32 4294901760, %v2869_v32  ;;  %v6841_v27 = vsub.f32 %v38_v52, %v6809_v57 }
 0x138   :  { %7652 = vst [vmem:[#allocation15_spill] sm:$0xff] %v6832_v37  ;;  %7653 = vst [vmem:[#allocation13_spill] sm:$0xff] %v6836_v51  ;;  %5106 = vmatpush3.bf16.msra.mxu1 %v7605_v44  ;;  %5084 = vmatprep.subr.bf16.mxu0 %v5083_v13  ;;  %v2877_v21 = vand.u32 4294901760, %v2876_v9  ;;  %v2995_v46 = vsub.f32 %v6763_v45, %v7417_v38  ;;  %v7416_v16 = vand.u32 4294901760, %v6804_v3  ;;  %v7415_v20 = vand.u32 4294901760, %v6812_v63 }
 0x139   :  { %7648 = vst [vmem:[#allocation5_spill] sm:$0xff] %v6824_v30  ;;  %7651 = vst [vmem:[#allocation10_spill] sm:$0xff] %v6830_v54  ;;  %v3813_v0 = vpop.f32.mrb[2].mxu0  ;;  %5108 = vmatprep.subr.bf16.mxu1 %v7606_v61  ;;  %v6850_v19 = vsub.f32 %v156_v11, %v2817_v42  ;;  %v6852_v52 = vpack.c.bf16 %v2989_v58, %v2982_v1  ;;  %v6854_v44 = vpack.c.bf16 %v2769_v62, %v2766_v43  ;;  %v159_v42 = vld [vmem:[#allocation2 + $0x3c0] sm:$0xff]  ;;  %v160_v1 = vld [vmem:[#allocation2 + $0x3c8] sm:$0xff] }
 0x13a   :  { %v3002_v13 = vsub.f32 %v6780_v8, %v7414_v53  ;;  %v3814_v39 = vpop.f32.mrb[3].mxu0  ;;  %v6859_v32 = vsub.f32 %v139_v5, %v2766_v43  ;;  %v6861_v9 = vsub.f32 %v140_v49, %v2769_v62  ;;  %v2820_v50 = vand.u32 4294901760, %v157_v28 }
 0x13b   :  { %7654 = vst [vmem:[#allocation14_spill] sm:$0xff] %v6854_v44  ;;  %v2823_v36 = vand.u32 4294901760, %v158_v10  ;;  %v3815_v6 = vadd.f32 %v3814_v39, %v3813_v0  ;;  %5086 = vmatpush3.bf16.msra.mxu0 %v6758_v47  ;;  %v2772_v61 = vand.u32 4294901760, %v141_v26  ;;  %v2775_v11 = vand.u32 4294901760, %v142_v15 }
 0x13c   :  { %v7423_v58 = vand.u32 4294901760, %v6841_v27  ;;  %5110 = vmatpush3.bf16.msra.mxu1 %v7607_v48  ;;  %5088 = vmatprep.subr.bf16.mxu0 %v6777_v35  ;;  %v6867_v53 = vpack.c.bf16 %v2877_v21, %v2870_v14  ;;  %v2996_v5 = vand.u32 4294901760, %v2995_v46  ;;  %v2883_v49 = vsub.f32 %v6804_v3, %v7416_v16 }
 0x13d   :  { %v2890_v47 = vsub.f32 %v6812_v63, %v7415_v20  ;;  %v646_v43 = vadd.f32 %v3815_v6, %v6682_v4  ;;  %5112 = vmatprep.subr.bf16.mxu1 %v7608_v17  ;;  %v3003_v62 = vand.u32 4294901760, %v3002_v13  ;;  %v7420_v48 = vand.u32 4294901760, %v6838_v29  ;;  %v6887_v4 = vld [vmem:[#allocation2 + $0x340] sm:$0xff] }
 0x13e   :  { %v7418_v35 = vand.u32 4294901760, %v6850_v19  ;;  %v6879_v14 = vpack.c.bf16 %v2823_v36, %v2820_v50  ;;  %v2826_v21 = vand.u32 4294901760, %v159_v42  ;;  %v2829_v46 = vand.u32 4294901760, %v160_v1 }
 0x13f   :  { %v7419_v0 = vand.u32 4294901760, %v6859_v32  ;;  %5090 = vmatpush3.bf16.msra.mxu0 %v6790_v25  ;;  %v6883_v39 = vsub.f32 %v157_v28, %v2820_v50  ;;  %v6885_v20 = vsub.f32 %v158_v10, %v2823_v36  ;;  %v7421_v17 = vand.u32 4294901760, %v6861_v9 }
 0x140   :  { %7655 = vst [vmem:[#allocation16_spill] sm:$0xff] %v6879_v14  ;;  %v2852_v13 = vsub.f32 %v6841_v27, %v7423_v58  ;;  %5114 = vmatpush3.bf16.msra.mxu1 %v6438_v60  ;;  %5092 = vmatprep.subr.bf16.mxu0 %v6796_v31  ;;  %v6895_v6 = vpack.c.bf16 %v2775_v11, %v2772_v61  ;;  %v2884_v25 = vand.u32 4294901760, %v2883_v49  ;;  %v2891_v50 = vand.u32 4294901760, %v2890_v47  ;;  %v161_v49 = vld [vmem:[#allocation2 + $0x3d0] sm:$0xff]  ;;  %v162_v47 = vld [vmem:[#allocation2 + $0x3d8] sm:$0xff] }
 0x141   :  { %v6897_v16 = vsub.f32 %v141_v26, %v2772_v61  ;;  %v6899_v28 = vsub.f32 %v142_v15, %v2775_v11  ;;  %5116 = vmatprep.subr.bf16.mxu1 %v6452_v33  ;;  %v6902_v10 = vpack.c.bf16 %v3003_v62, %v2996_v5  ;;  %v3009_v36 = vsub.f32 %v6838_v29, %v7420_v48  ;;  %v144_v15 = vld [vmem:[#allocation2 + $0x348] sm:$0xff] }
 0x142   :  { %7656 = vst [vmem:[#allocation8_spill] sm:$0xff] %v6895_v6  ;;  %v3016_v60 = vsub.f32 %v6850_v19, %v7418_v35  ;;  %v3848_v31 = vpop.f32.mrb[2].mxu1  ;;  %v6910_v38 = vpack.c.bf16 %v2829_v46, %v2826_v21  ;;  %v6912_v26 = vsub.f32 %v159_v42, %v2826_v21  ;;  %v2778_v61 = vand.u32 4294901760, %v6887_v4  ;;  %v145_v42 = vld [vmem:[#allocation2 + $0x350] sm:$0xff] }
 0x143   :  { %7657 = vst [vmem:[#allocation9_spill] sm:$0xff] %v6897_v16  ;;  %7658 = vst [vmem:[#allocation11_spill] sm:$0xff] %v6899_v28  ;;  %v2897_v33 = vsub.f32 %v6859_v32, %v7419_v0  ;;  %v3849_v11 = vpop.f32.mrb[3].mxu1  ;;  %5094 = vmatpush3.bf16.msra.mxu0 %v6802_v2  ;;  %v2904_v5 = vsub.f32 %v6861_v9, %v7421_v17  ;;  %v2853_v21 = vand.u32 4294901760, %v2852_v13  ;;  %v7430_v2 = vand.u32 4294901760, %v6897_v16  ;;  %v146_v13 = vld [vmem:[#allocation2 + $0x358] sm:$0xff] }
 0x144   :  { %7659 = vst [vmem:[#allocation12_spill] sm:$0xff] %v6910_v38  ;;  %v3850_v35 = vadd.f32 %v3849_v11, %v3848_v31  ;;  %5118 = vmatpush3.bf16.msra.mxu1 %v6469_v56  ;;  %5128 = vmatprep.subr.bf16.mxu0 %v6824_v30  ;;  %v6926_v0 = vsub.f32 %v160_v1, %v2829_v46  ;;  %v7433_v48 = vand.u32 4294901760, %v6899_v28  ;;  %v3010_v41 = vand.u32 4294901760, %v3009_v36 }
 0x145   :  { %5120 = vmatprep.subr.bf16.mxu1 %v6497_v22  ;;  %v6931_v17 = vpack.c.bf16 %v2891_v50, %v2884_v25  ;;  %v3017_v58 = vand.u32 4294901760, %v3016_v60  ;;  %v2781_v62 = vand.u32 4294901760, %v144_v15  ;;  %v6937_v56 = vsub.f32 %v6887_v4, %v2778_v61 }
 0x146   :  { %v6933_v31 = vadd.f32 %v3850_v35, %v646_v43  ;;  %2644 = vmatmul.mubr.f32.vlgmr.msra.gmra.mrb[16].mxu0 %v6518_v23  ;;  %v2832_v1 = vand.u32 4294901760, %v161_v49  ;;  %v2835_v46 = vand.u32 4294901760, %v162_v47  ;;  %v2898_v11 = vand.u32 4294901760, %v2897_v33  ;;  %v163_v35 = vld [vmem:[#allocation2 + $0x3e0] sm:$0xff] }
 0x147   :  { %5130 = vmatpush3.bf16.msra.mxu0 %v6830_v54  ;;  %v2905_v22 = vand.u32 4294901760, %v2904_v5  ;;  %v7660_v25 = vand.u32 4294901760, %v6883_v39  ;;  %v7661_v36 = vand.u32 4294901760, %v6885_v20  ;;  %2854 = vmatprep.mubr.f32.mxu0 %v2853_v21  ;;  %v2784_v4 = vand.u32 4294901760, %v145_v42 }
 0x148   :  { %5122 = vmatpush3.bf16.msra.mxu1 %v6576_v40  ;;  %5132 = vmatprep.subr.bf16.mxu0 %v6832_v37  ;;  %v2787_v60 = vand.u32 4294901760, %v146_v13  ;;  %v2911_v33 = vsub.f32 %v6897_v16, %v7430_v2  ;;  %v2918_v5 = vsub.f32 %v6899_v28, %v7433_v48  ;;  %v6957_v21 = vpack.c.bf16 %v2781_v62, %v2778_v61 }
 0x149   :  { %v3023_v50 = vsub.f32 %v6883_v39, %v7660_v25  ;;  %v3030_v43 = vsub.f32 %v6885_v20, %v7661_v36  ;;  %v164_v25 = vld [vmem:[#allocation2 + $0x3e8] sm:$0xff]  ;;  %5124 = vmatprep.subr.bf16.mxu1 %v6578_v24  ;;  %v6955_v36 = vpack.c.bf16 %v3017_v58, %v3010_v41  ;;  %v6959_v40 = vsub.f32 %v144_v15, %v2781_v62 }
 0x14a   :  { %7662 = vst [vmem:[#allocation6_spill] sm:$0xff] %v6957_v21  ;;  %v7436_v37 = vand.u32 4294901760, %v6912_v26  ;;  %v6962_v54 = vpack.c.bf16 %v2835_v46, %v2832_v1  ;;  %v6964_v30 = vsub.f32 %v161_v49, %v2832_v1  ;;  %v6966_v2 = vsub.f32 %v162_v47, %v2835_v46  ;;  %v148_v46 = vld [vmem:[#allocation2 + $0x368] sm:$0xff] }
 0x14b   :  { %v2838_v16 = vand.u32 4294901760, %v163_v35  ;;  %5134 = vmatpush3.bf16.msra.mxu0 %v6834_v7  ;;  %v3024_v48 = vand.u32 4294901760, %v3023_v50  ;;  %v3031_v28 = vand.u32 4294901760, %v3030_v43  ;;  %v2841_v24 = vand.u32 4294901760, %v164_v25  ;;  %v6990_v43 = vld [vmem:[#allocation2 + $0x3f0] sm:$0xff] }
 0x14c   :  { %7663 = vst [vmem:[#allocation17_spill] sm:$0xff] %v6962_v54  ;;  %v7437_v41 = vand.u32 4294901760, %v6926_v0  ;;  %5126 = vmatpush3.bf16.msra.mxu1 %v6601_v55  ;;  %5136 = vmatprep.subr.bf16.mxu0 %v6836_v51  ;;  %v6972_v58 = vpack.c.bf16 %v2905_v22, %v2898_v11  ;;  %v6974_v15 = vpack.c.bf16 %v2787_v60, %v2784_v4  ;;  %v2912_v61 = vand.u32 4294901760, %v2911_v33  ;;  %v147_v55 = vld [vmem:[#allocation2 + $0x360] sm:$0xff]  ;;  %v37_v33 = vld [vmem:[%s7268_s0 + $0x30] sm:$0xff] }
 0x14d   :  { %v2919_v49 = vand.u32 4294901760, %v2918_v5  ;;  %5160 = vmatprep.subr.bf16.mxu1 %v6852_v52  ;;  %v6977_v47 = vsub.f32 %v145_v42, %v2784_v4  ;;  %v6979_v62 = vsub.f32 %v146_v13, %v2787_v60  ;;  %v6984_v1 = vsub.f32 %v6912_v26, %v7436_v37  ;;  %v6992_v52 = vld [vmem:[#allocation2 + $0x3f8] sm:$0xff] }
 0x14e   :  { %v7438_v11 = vand.u32 4294901760, %v6937_v56  ;;  %v6987_v22 = vsub.f32 %v163_v35, %v2838_v16  ;;  %v7445_v50 = vand.u32 4294901760, %v6959_v40  ;;  %v5171_v4 = vpack.c.bf16 %v3031_v28, %v3024_v48  ;;  %v7019_v42 = vld [vmem:[#allocation2 + $0x378] sm:$0xff] }
 0x14f   :  { %7664 = vst [vmem:[#allocation18_spill] sm:$0xff] %v6979_v62  ;;  %2748 = vmatmul.mubr.f32.vlgmr.msra.gmra.mrb[16].mxu1 %v6518_v23  ;;  %5138 = vmatpush3.bf16.msra.mxu0 %v6854_v44  ;;  %v6998_v60 = vpack.c.bf16 %v2841_v24, %v2838_v16  ;;  %v3044_v35 = vsub.f32 %v6926_v0, %v7437_v41  ;;  %v2790_v23 = vand.u32 4294901760, %v147_v55  ;;  %v2793_v13 = vand.u32 4294901760, %v148_v46 }
 0x150   :  { %7665 = vst [vmem:[#allocation19_spill] sm:$0xff] %v6987_v22  ;;  %5162 = vmatpush3.bf16.msra.mxu1 %v6867_v53  ;;  %5140 = vmatprep.subr.bf16.mxu0 %v6879_v14  ;;  %v5173_v5 = vpack.c.bf16 %v2919_v49, %v2912_v61  ;;  %v7008_v37 = vsub.f32 %v164_v25, %v2841_v24  ;;  %v3038_v16 = vand.u32 4294901760, %v6984_v1  ;;  %v2844_v28 = vand.u32 4294901760, %v6990_v43  ;;  %v7017_v53 = vld [vmem:[#allocation2 + $0x370] sm:$0xff] }
 0x151   :  { %5164 = vmatprep.subr.bf16.mxu1 %v6902_v10  ;;  %v2925_v48 = vsub.f32 %v6937_v56, %v7438_v11  ;;  %v2847_v41 = vand.u32 4294901760, %v6992_v52  ;;  %3090 = vmatprep.mubr.f32.mxu1 %v6809_v57  ;;  %v2932_v10 = vsub.f32 %v6959_v40, %v7445_v50  ;;  %v7666_v25 = vand.u32 4294901760, %v6964_v30 }
 0x152   :  { %v7667_v61 = vand.u32 4294901760, %v6966_v2  ;;  %v7031_v1 = vand.u32 4294901760, %v37_v33  ;;  %v3045_v11 = vand.u32 4294901760, %v3044_v35  ;;  %v7041_v50 = vsub.f32 %v148_v46, %v2793_v13 }
 0x153   :  { %v3051_v24 = vsub.f32 %v6964_v30, %v7666_v25  ;;  %5142 = vmatpush3.bf16.msra.mxu0 %v6895_v6  ;;  %v7039_v25 = vsub.f32 %v147_v55, %v2790_v23  ;;  %v2799_v51 = vand.u32 4294901760, %v7019_v42  ;;  %v2926_v35 = vand.u32 4294901760, %v2925_v48 }
 0x154   :  { %v3058_v49 = vsub.f32 %v6966_v2, %v7667_v61  ;;  %5166 = vmatpush3.bf16.msra.mxu1 %v6931_v17  ;;  %5144 = vmatprep.subr.bf16.mxu0 %v6910_v38  ;;  %v2796_v61 = vand.u32 4294901760, %v7017_v53  ;;  %v7047_v14 = vsub.f32 %v6990_v43, %v2844_v28  ;;  %v7050_v44 = vsub.f32 %v6992_v52, %v2847_v41 }
 0x155   :  { %5168 = vmatprep.subr.bf16.mxu1 %v6955_v36  ;;  %v2933_v57 = vand.u32 4294901760, %v2932_v10  ;;  %v3052_v55 = vand.u32 4294901760, %v3051_v24  ;;  %v7054_v46 = vsub.f32 %v37_v33, %v7031_v1  ;;  %v7057_v6 = vpack.c.bf16 %v2793_v13, %v2790_v23 }
 0x156   :  { %v3059_v38 = vand.u32 4294901760, %v3058_v49  ;;  %v7668_v36 = vand.u32 4294901760, %v6977_v47  ;;  %v7669_v48 = vand.u32 4294901760, %v6979_v62  ;;  %v7670_v17 = vand.u32 4294901760, %v6987_v22 }
 0x157   :  { %5146 = vmatpush3.bf16.msra.mxu0 %v6957_v21  ;;  %v7071_v33 = vsub.f32 %v7017_v53, %v2796_v61  ;;  %v7074_v13 = vsub.f32 %v7019_v42, %v2799_v51  ;;  %v2959_v24 = vand.u32 4294901760, %v7041_v50  ;;  %v5177_v21 = vpack.c.bf16 %v2933_v57, %v2926_v35 }
 0x158   :  { %v2939_v43 = vsub.f32 %v6977_v47, %v7668_v36  ;;  %v2946_v52 = vsub.f32 %v6979_v62, %v7669_v48  ;;  %v3065_v10 = vsub.f32 %v6987_v22, %v7670_v17  ;;  %5170 = vmatpush3.bf16.msra.mxu1 %v6972_v58  ;;  %5148 = vmatprep.subr.bf16.mxu0 %v6962_v54  ;;  %v7671_v48 = vand.u32 4294901760, %v7008_v37 }
 0x159   :  { %v3883_v49 = vpop.f32.mrb[4].mxu0  ;;  %5172 = vmatprep.subr.bf16.mxu1 %v5171_v4  ;;  %v5175_v36 = vpack.c.bf16 %v3045_v11, %v3038_v16  ;;  %v7462_v58 = vand.u32 4294901760, %v7047_v14  ;;  %v7083_v22 = vpack.c.bf16 %v2847_v41, %v2844_v28  ;;  %v5179_v42 = vpack.c.bf16 %v3059_v38, %v3052_v55 }
 0x15a   :  { %v3072_v17 = vsub.f32 %v7008_v37, %v7671_v48  ;;  %v3884_v53 = vpop.f32.mrb[5].mxu0  ;;  %v2857_v23 = vand.u32 4294901760, %v7054_v46  ;;  %v2940_v4 = vand.u32 4294901760, %v2939_v43  ;;  %v2947_v11 = vand.u32 4294901760, %v2946_v52 }
 0x15b   :  { %v3885_v62 = vadd.f32 %v3884_v53, %v3883_v49  ;;  %5150 = vmatpush3.bf16.msra.mxu0 %v6974_v15  ;;  %v3066_v16 = vand.u32 4294901760, %v3065_v10  ;;  %v7672_v48 = vand.u32 4294901760, %v7039_v25  ;;  %v2960_v57 = vsub.f32 %v7041_v50, %v2959_v24 }
 0x15c   :  { %5174 = vmatpush3.bf16.msra.mxu1 %v5173_v5  ;;  %5152 = vmatprep.subr.bf16.mxu0 %v6998_v60  ;;  %v7460_v38 = vand.u32 4294901760, %v7071_v33  ;;  %v7461_v41 = vand.u32 4294901760, %v7074_v13  ;;  %v3073_v35 = vand.u32 4294901760, %v3072_v17  ;;  %v3079_v5 = vsub.f32 %v7047_v14, %v7462_v58 }
 0x15d   :  { %v2953_v54 = vsub.f32 %v7039_v25, %v7672_v48  ;;  %v922_v28 = vadd.f32 %v3885_v62, %v6933_v31  ;;  %5176 = vmatprep.subr.bf16.mxu1 %v5175_v36  ;;  %v7673_v55 = vand.u32 4294901760, %v7050_v44  ;;  %v2858_v52 = vsub.f32 %v7054_v46, %v2857_v23 }
 0x15e   :  { %v7107_v10 = vpack.c.bf16 %v2799_v51, %v2796_v61  ;;  %v5181_v49 = vpack.c.bf16 %v2947_v11, %v2940_v4  ;;  %v5191_v31 = vpack.c.bf16 %v6706_v12, %v6699_v34  ;;  %v2961_v36 = vand.u32 4294901760, %v2960_v57 }
 0x15f   :  { %v3086_v43 = vsub.f32 %v7050_v44, %v7673_v55  ;;  %5154 = vmatpush3.bf16.msra.mxu0 %v7057_v6  ;;  %v2954_v62 = vand.u32 4294901760, %v2953_v54  ;;  %v2967_v17 = vsub.f32 %v7071_v33, %v7460_v38  ;;  %v2974_v53 = vsub.f32 %v7074_v13, %v7461_v41 }
 0x160   :  { %5178 = vmatpush3.bf16.msra.mxu1 %v5177_v21  ;;  %5156 = vmatprep.subr.bf16.mxu0 %v7083_v22  ;;  %v5183_v51 = vpack.c.bf16 %v3073_v35, %v3066_v16  ;;  %v3080_v61 = vand.u32 4294901760, %v3079_v5  ;;  %v2859_v48 = vand.u32 4294901760, %v2858_v52  ;;  %v5193_v54 = vpack.c.bf16 %v6729_v59, %v6719_v18 }
 0x161   :  { %5180 = vmatprep.subr.bf16.mxu1 %v5179_v42  ;;  %v3087_v4 = vand.u32 4294901760, %v3086_v43  ;;  %v5195_v21 = vpack.c.bf16 %v6780_v8, %v6763_v45  ;;  %v5185_v38 = vpack.c.bf16 %v2961_v36, %v2954_v62  ;;  %v2968_v41 = vand.u32 4294901760, %v2967_v17  ;;  %v7677_v36 = vld [vmem:[#allocation10_spill] sm:$0xff] }
 0x162   :  { %v3918_v11 = vpop.f32.mrb[4].mxu1  ;;  %v2975_v42 = vand.u32 4294901760, %v2974_v53  ;;  %v5197_v5 = vpack.c.bf16 %v6812_v63, %v6804_v3  ;;  %v5199_v52 = vpack.c.bf16 %v6850_v19, %v6838_v29  ;;  %v5207_v17 = vpack.c.bf16 %v6926_v0, %v6912_v26  ;;  %v7678_v53 = vld [vmem:[#allocation15_spill] sm:$0xff] }
 0x163   :  { %v3919_v55 = vpop.f32.mrb[5].mxu1  ;;  %5158 = vmatpush3.bf16.msra.mxu0 %v7107_v10  ;;  %v5187_v16 = vpack.c.bf16 %v3087_v4, %v3080_v61  ;;  %v5209_v61 = vpack.c.bf16 %v6959_v40, %v6937_v56  ;;  %v5211_v4 = vpack.c.bf16 %v6966_v2, %v6964_v30 }
 0x164   :  { %v3920_v57 = vadd.f32 %v3919_v55, %v3918_v11  ;;  %5182 = vmatpush3.bf16.msra.mxu1 %v5181_v49  ;;  %5192 = vmatprep.subr.bf16.mxu0 %v5191_v31  ;;  %v5189_v43 = vpack.c.bf16 %v2975_v42, %v2968_v41  ;;  %v5201_v49 = vpack.c.bf16 %v6861_v9, %v6859_v32  ;;  %v7674_v31 = vld [vmem:[#allocation5_spill] sm:$0xff]  ;;  %v7676_v41 = vld [vmem:[#allocation11_spill] sm:$0xff]  ;;  %v7684_v42 = vld [vmem:[#allocation16_spill] sm:$0xff] }
 0x165   :  { %5184 = vmatprep.subr.bf16.mxu1 %v5183_v51  ;;  %v7679_v51 = vand.u32 4294901760, %v6841_v27  ;;  %v7680_v11 = vld [vmem:[#allocation13_spill] sm:$0xff] }
 0x166   :  { %v1026_v35 = vadd.f32 %v3920_v57, %v922_v28  ;;  %2860 = vmatmul.mubr.f32.vlgmr.msra.gmra.mrb[18].mxu0 %v2859_v48  ;;  %v5203_v28 = vpack.c.bf16 %v6885_v20, %v6883_v39  ;;  %v7681_v48 = vld [vmem:[#allocation18_spill] sm:$0xff] }
 0x167   :  { %5194 = vmatpush3.bf16.msra.mxu0 %v5193_v54  ;;  %3227 = vmatprep.mubr.f32.mxu0 %v6841_v27  ;;  %v5213_v55 = vpack.c.bf16 %v7681_v48, %v6977_v47  ;;  %v7682_v54 = vld [vmem:[#allocation14_spill] sm:$0xff]  ;;  %v7683_v27 = vld [vmem:[#allocation19_spill] sm:$0xff] }
 0x168   :  { %5186 = vmatpush3.bf16.msra.mxu1 %v5185_v38  ;;  %5196 = vmatprep.subr.bf16.mxu0 %v5195_v21  ;;  %v7675_v38 = vld [vmem:[#allocation9_spill] sm:$0xff]  ;;  %v5215_v21 = vpack.c.bf16 %v7008_v37, %v7683_v27 }
 0x169   :  { %5188 = vmatprep.subr.bf16.mxu1 %v5187_v16  ;;  %v5205_v62 = vpack.c.bf16 %v7676_v41, %v7675_v38 }
 0x16b   :  { %5198 = vmatpush3.bf16.msra.mxu0 %v5197_v5 }
 0x16c   :  { %5190 = vmatpush3.bf16.msra.mxu1 %v5189_v43  ;;  %5200 = vmatprep.subr.bf16.mxu0 %v5199_v52  ;;  %v5217_v43 = vpack.c.bf16 %v7041_v50, %v7039_v25  ;;  %v7685_v52 = vld [vmem:[#allocation8_spill] sm:$0xff] }
 0x16d   :  { %5224 = vmatprep.subr.bf16.mxu1 %v7674_v31 }
 0x16f   :  { %3092 = vmatmul.mubr.f32.vlgmr.msra.gmra.mrb[18].mxu1 %v7031_v1  ;;  %5202 = vmatpush3.bf16.msra.mxu0 %v5201_v49  ;;  %v5219_v49 = vpack.c.bf16 %v7050_v44, %v7047_v14 }
 0x170   :  { %5226 = vmatpush3.bf16.msra.mxu1 %v7677_v36  ;;  %5204 = vmatprep.subr.bf16.mxu0 %v5203_v28 }
 0x171   :  { %5228 = vmatprep.subr.bf16.mxu1 %v7678_v53  ;;  %3334 = vmatprep.mubr.f32.mxu1 %v7679_v51  ;;  %v7687_v51 = vld [vmem:[#allocation6_spill] sm:$0xff] }
 0x173   :  { %5206 = vmatpush3.bf16.msra.mxu0 %v5205_v62  ;;  %v7686_v62 = vld [vmem:[#allocation12_spill] sm:$0xff] }
 0x174   :  { %5230 = vmatpush3.bf16.msra.mxu1 %v6834_v7  ;;  %5208 = vmatprep.subr.bf16.mxu0 %v5207_v17  ;;  %v5221_v17 = vpack.c.bf16 %v7074_v13, %v7071_v33 }
 0x175   :  { %5232 = vmatprep.subr.bf16.mxu1 %v7680_v11 }
 0x177   :  { %5210 = vmatpush3.bf16.msra.mxu0 %v5209_v61  ;;  %v7688_v61 = vand.u32 4294901760, %v6699_v34  ;;  %v7694_v34 = vand.u32 4294901760, %v6780_v8  ;;  %v7699_v8 = vand.u32 4294901760, %v6850_v19  ;;  %v7705_v19 = vand.u32 4294901760, %v7676_v41 }
 0x178   :  { %5234 = vmatpush3.bf16.msra.mxu1 %v7682_v54  ;;  %5212 = vmatprep.subr.bf16.mxu0 %v5211_v4  ;;  %v7689_v4 = vand.u32 4294901760, %v6706_v12 }
 0x179   :  { %v3953_v57 = vpop.f32.mrb[6].mxu0  ;;  %5236 = vmatprep.subr.bf16.mxu1 %v7684_v42 }
 0x17a   :  { %v3954_v16 = vpop.f32.mrb[7].mxu0 }
 0x17b   :  { %v3955_v5 = vadd.f32 %v3954_v16, %v3953_v57  ;;  %5214 = vmatpush3.bf16.msra.mxu0 %v5213_v55  ;;  %v5255_v55 = vpack.c.bf16 %v7689_v4, %v7688_v61  ;;  %v7690_v57 = vld [vmem:[#allocation17_spill] sm:$0xff]  ;;  %v7697_v4 = vld [vmem:[#allocation7_spill] sm:$0xff] }
 0x17c   :  { %5238 = vmatpush3.bf16.msra.mxu1 %v7685_v52  ;;  %5216 = vmatprep.subr.bf16.mxu0 %v5215_v21 }
 0x17d   :  { %v1138_v28 = vadd.f32 %v3955_v5, %v1026_v35  ;;  %5240 = vmatprep.subr.bf16.mxu1 %v7686_v62  ;;  %v7691_v35 = vand.u32 4294901760, %v6719_v18  ;;  %v7692_v5 = vand.u32 4294901760, %v6729_v59  ;;  %v7695_v18 = vand.u32 4294901760, %v6804_v3 }
 0x17e   :  { %v7696_v59 = vand.u32 4294901760, %v6812_v63  ;;  %v7701_v3 = vand.u32 4294901760, %v6861_v9  ;;  %v7702_v63 = vand.u32 4294901760, %v6883_v39  ;;  %v7706_v9 = vand.u32 4294901760, %v6912_v26 }
 0x17f   :  { %5218 = vmatpush3.bf16.msra.mxu0 %v5217_v43  ;;  %v5257_v43 = vpack.c.bf16 %v7692_v5, %v7691_v35  ;;  %v7707_v39 = vand.u32 4294901760, %v6926_v0  ;;  %v7711_v26 = vand.u32 4294901760, %v6966_v2  ;;  %v7712_v0 = vand.u32 4294901760, %v6977_v47 }
 0x180   :  { %5242 = vmatpush3.bf16.msra.mxu1 %v7687_v51  ;;  %5220 = vmatprep.subr.bf16.mxu0 %v5219_v49  ;;  %v7693_v49 = vand.u32 4294901760, %v6763_v45  ;;  %v7698_v45 = vand.u32 4294901760, %v6838_v29  ;;  %v7704_v29 = vand.u32 4294901760, %v7675_v38  ;;  %v7710_v38 = vand.u32 4294901760, %v6964_v30 }
 0x181   :  { %5244 = vmatprep.subr.bf16.mxu1 %v7690_v57  ;;  %v7720_v5 = vand.u32 4294901760, %v7074_v13 }
 0x182   :  { %v3988_v21 = vpop.f32.mrb[6].mxu1  ;;  %v5259_v12 = vpack.c.bf16 %v7694_v34, %v7693_v49  ;;  %v5275_v41 = vpack.c.bf16 %v7711_v26, %v7710_v38 }
 0x183   :  { %v3989_v16 = vpop.f32.mrb[7].mxu1  ;;  %5222 = vmatpush3.bf16.msra.mxu0 %v5221_v17  ;;  %v5261_v17 = vpack.c.bf16 %v7696_v59, %v7695_v18 }
 0x184   :  { %v3990_v58 = vadd.f32 %v3989_v16, %v3988_v21  ;;  %5246 = vmatpush3.bf16.msra.mxu1 %v6974_v15  ;;  %5256 = vmatprep.subr.bf16.mxu0 %v5255_v55  ;;  %v5263_v55 = vpack.c.bf16 %v7699_v8, %v7698_v45  ;;  %v7703_v21 = vand.u32 4294901760, %v6885_v20  ;;  %v5271_v20 = vpack.c.bf16 %v7707_v39, %v7706_v9 }
 0x185   :  { %5248 = vmatprep.subr.bf16.mxu1 %v6998_v60 }
 0x186   :  { %v1370_v61 = vadd.f32 %v3990_v58, %v1138_v28  ;;  %3230 = vmatmul.mubr.f32.vlgmr.msra.gmra.mrb[20].mxu0 %v7054_v46  ;;  %v7700_v58 = vand.u32 4294901760, %v6859_v32  ;;  %v5267_v16 = vpack.c.bf16 %v7703_v21, %v7702_v63  ;;  %v5269_v32 = vpack.c.bf16 %v7705_v19, %v7704_v29 }
 0x187   :  { %5258 = vmatpush3.bf16.msra.mxu0 %v5257_v43  ;;  %3504 = vmatprep.mubr.f32.mxu0 %v7697_v4  ;;  %v7708_v46 = vand.u32 4294901760, %v6937_v56  ;;  %v7714_v56 = vand.u32 4294901760, %v7683_v27 }
 0x188   :  { %5250 = vmatpush3.bf16.msra.mxu1 %v7057_v6  ;;  %5260 = vmatprep.subr.bf16.mxu0 %v5259_v12  ;;  %v5265_v28 = vpack.c.bf16 %v7701_v3, %v7700_v58 }
 0x189   :  { %5252 = vmatprep.subr.bf16.mxu1 %v7083_v22 }
 0x18b   :  { %5262 = vmatpush3.bf16.msra.mxu0 %v5261_v17 }
 0x18c   :  { %5254 = vmatpush3.bf16.msra.mxu1 %v7107_v10  ;;  %5264 = vmatprep.subr.bf16.mxu0 %v5263_v55 }
 0x18d   :  { %5288 = vmatprep.subr.bf16.mxu1 %v7674_v31 }
 0x18f   :  { %3338 = vmatmul.mubr.f32.vlgmr.msra.gmra.mrb[20].mxu1 %v2857_v23  ;;  %5266 = vmatpush3.bf16.msra.mxu0 %v5265_v28  ;;  %v7709_v23 = vand.u32 4294901760, %v6959_v40 }
 0x190   :  { %5290 = vmatpush3.bf16.msra.mxu1 %v7677_v36  ;;  %5268 = vmatprep.subr.bf16.mxu0 %v5267_v16  ;;  %v7713_v36 = vand.u32 4294901760, %v7681_v48  ;;  %v7717_v48 = vand.u32 4294901760, %v7047_v14 }
 0x191   :  { %5292 = vmatprep.subr.bf16.mxu1 %v7678_v53  ;;  %3608 = vmatprep.mubr.f32.mxu1 %v7697_v4  ;;  %v5273_v31 = vpack.c.bf16 %v7709_v23, %v7708_v46 }
 0x192   :  { %v5277_v53 = vpack.c.bf16 %v7713_v36, %v7712_v0 }
 0x193   :  { %5270 = vmatpush3.bf16.msra.mxu0 %v5269_v32 }
 0x194   :  { %5294 = vmatpush3.bf16.msra.mxu1 %v6834_v7  ;;  %5272 = vmatprep.subr.bf16.mxu0 %v5271_v20  ;;  %v7715_v7 = vand.u32 4294901760, %v7008_v37 }
 0x195   :  { %5296 = vmatprep.subr.bf16.mxu1 %v7680_v11  ;;  %v7716_v11 = vand.u32 4294901760, %v7039_v25 }
 0x196   :  { %v5279_v40 = vpack.c.bf16 %v7715_v7, %v7714_v56 }
 0x197   :  { %5274 = vmatpush3.bf16.msra.mxu0 %v5273_v31  ;;  %v5281_v47 = vpack.c.bf16 %v2959_v24, %v7716_v11 }
 0x198   :  { %5298 = vmatpush3.bf16.msra.mxu1 %v7682_v54  ;;  %5276 = vmatprep.subr.bf16.mxu0 %v5275_v41  ;;  %v7718_v54 = vand.u32 4294901760, %v7050_v44 }
 0x199   :  { %v4023_v30 = vpop.f32.mrb[8].mxu0  ;;  %5300 = vmatprep.subr.bf16.mxu1 %v7684_v42  ;;  %v7719_v42 = vand.u32 4294901760, %v7071_v33 }
 0x19a   :  { %v4024_v2 = vpop.f32.mrb[9].mxu0  ;;  %v5283_v37 = vpack.c.bf16 %v7718_v54, %v7717_v48 }
 0x19b   :  { %v4025_v35 = vadd.f32 %v4024_v2, %v4023_v30  ;;  %5278 = vmatpush3.bf16.msra.mxu0 %v5277_v53  ;;  %v5285_v25 = vpack.c.bf16 %v7720_v5, %v7719_v42 }
 0x19c   :  { %5302 = vmatpush3.bf16.msra.mxu1 %v7685_v52  ;;  %5280 = vmatprep.subr.bf16.mxu0 %v5279_v40 }
 0x19d   :  { %v1508_v27 = vadd.f32 %v4025_v35, %v1370_v61  ;;  %5304 = vmatprep.subr.bf16.mxu1 %v7686_v62 }
 0x19f   :  { %5282 = vmatpush3.bf16.msra.mxu0 %v5281_v47 }
 0x1a0   :  { %5306 = vmatpush3.bf16.msra.mxu1 %v7687_v51  ;;  %5284 = vmatprep.subr.bf16.mxu0 %v5283_v37  ;;  %v3710_v37 = vld [vmem:[%s7270_s2] ss:$0 sm:$0xff]  ;;  %s5367_s2 = smov 1  }
 0x1a1   :  { %5308 = vmatprep.subr.bf16.mxu1 %v7690_v57 }
 0x1a2   :  { %v4058_v50 = vpop.f32.mrb[8].mxu1 }
 0x1a3   :  { %v4059_v24 = vpop.f32.mrb[9].mxu1  ;;  %5286 = vmatpush3.bf16.msra.mxu0 %v5285_v25 }
 0x1a4   :  { %v4060_v14 = vadd.f32 %v4059_v24, %v4058_v50  ;;  %5310 = vmatpush3.bf16.msra.mxu1 %v6974_v15  ;;  %v3625_v24 = vld [vmem:[%s7271_s3] sm:$0xff]  ;;  %s5368_s3 = smov 32  }
 0x1a5   :  { %5312 = vmatprep.subr.bf16.mxu1 %v6998_v60 }
 0x1a6   :  { %v1616_v44 = vadd.f32 %v4060_v14, %v1508_v27  ;;  %3506 = vmatmul.mubr.f32.vlgmr.msra.gmra.mrb[22].mxu0 %v7031_v1 }
 0x1a8   :  { %5314 = vmatpush3.bf16.msra.mxu1 %v7057_v6 }
 0x1a9   :  { %5316 = vmatprep.subr.bf16.mxu1 %v7083_v22 }
 0x1ac   :  { %5318 = vmatpush3.bf16.msra.mxu1 %v7107_v10 }
 0x1af   :  { %3610 = vmatmul.mubr.f32.vlgmr.msra.gmra.mrb[22].mxu1 %v7031_v1 }
 0x1b9   :  { %v4093_v33 = vpop.f32.mrb[10].mxu0 }
 0x1ba   :  { %v4094_v13 = vpop.f32.mrb[11].mxu0 }
 0x1bb   :  { %v4095_v52 = vadd.f32 %v4094_v13, %v4093_v33 }
 0x1bd   :  { %v1784_v62 = vadd.f32 %v4095_v52, %v1616_v44 }
 0x1c2   :  { %v4128_v51 = vpop.f32.mrb[10].mxu1 }
 0x1c3   :  { %v4129_v57 = vpop.f32.mrb[11].mxu1 }
 0x1c4   :  { %v4130_v15 = vadd.f32 %v4129_v57, %v4128_v51 }
 0x1c6   :  { %v1888_v43 = vadd.f32 %v4130_v15, %v1784_v62 }
 0x1d9   :  { %v4163_v60 = vpop.f32.mrb[12].mxu0 }
 0x1da   :  { %v4164_v49 = vpop.f32.mrb[13].mxu0 }
 0x1db   :  { %v4165_v34 = vadd.f32 %v4164_v49, %v4163_v60 }
 0x1dd   :  { %v2000_v12 = vadd.f32 %v4165_v34, %v1888_v43 }
 0x1e2   :  { %v4198_v61 = vpop.f32.mrb[12].mxu1 }
 0x1e3   :  { %v4199_v6 = vpop.f32.mrb[13].mxu1 }
 0x1e4   :  { %v4200_v18 = vadd.f32 %v4199_v6, %v4198_v61 }
 0x1e6   :  { %v2232_v22 = vadd.f32 %v4200_v18, %v2000_v12 }
 0x1f9   :  { %v4233_v59 = vpop.f32.mrb[14].mxu0 }
 0x1fa   :  { %v4234_v10 = vpop.f32.mrb[15].mxu0 }
 0x1fb   :  { %v4235_v17 = vadd.f32 %v4234_v10, %v4233_v59 }
 0x1fd   :  { %v2370_v1 = vadd.f32 %v4235_v17, %v2232_v22 }
 0x202   :  { %v4268_v4 = vpop.f32.mrb[14].mxu1 }
 0x203   :  { %v4269_v45 = vpop.f32.mrb[15].mxu1 }
 0x204   :  { %v4270_v8 = vadd.f32 %v4269_v45, %v4268_v4 }
 0x206   :  { %v2478_v55 = vadd.f32 %v4270_v8, %v2370_v1 }
 0x219   :  { %v4303_v58 = vpop.f32.mrb[16].mxu0 }
 0x21a   :  { %v4304_v3 = vpop.f32.mrb[17].mxu0 }
 0x21b   :  { %v4305_v28 = vadd.f32 %v4304_v3, %v4303_v58 }
 0x21d   :  { %v2646_v63 = vadd.f32 %v4305_v28, %v2478_v55 }
 0x222   :  { %v4338_v21 = vpop.f32.mrb[16].mxu1 }
 0x223   :  { %v4339_v16 = vpop.f32.mrb[17].mxu1 }
 0x224   :  { %v4340_v29 = vadd.f32 %v4339_v16, %v4338_v21 }
 0x226   :  { %v2750_v19 = vadd.f32 %v4340_v29, %v2646_v63 }
 0x239   :  { %v4373_v32 = vpop.f32.mrb[18].mxu0 }
 0x23a   :  { %v4374_v9 = vpop.f32.mrb[19].mxu0 }
 0x23b   :  { %v4375_v39 = vadd.f32 %v4374_v9, %v4373_v32 }
 0x23d   :  { %v2862_v20 = vadd.f32 %v4375_v39, %v2750_v19 }
 0x242   :  { %v4408_v46 = vpop.f32.mrb[18].mxu1 }
 0x243   :  { %v4409_v23 = vpop.f32.mrb[19].mxu1 }
 0x244   :  { %v4410_v31 = vadd.f32 %v4409_v23, %v4408_v46 }
 0x246   :  { %v3094_v38 = vadd.f32 %v4410_v31, %v2862_v20 }
 0x259   :  { %v4443_v26 = vpop.f32.mrb[20].mxu0 }
 0x25a   :  { %v4444_v41 = vpop.f32.mrb[21].mxu0 }
 0x25b   :  { %v4445_v0 = vadd.f32 %v4444_v41, %v4443_v26 }
 0x25d   :  { %v3232_v36 = vadd.f32 %v4445_v0, %v3094_v38 }
 0x262   :  { %v4478_v53 = vpop.f32.mrb[20].mxu1 }
 0x263   :  { %v4479_v56 = vpop.f32.mrb[21].mxu1 }
 0x264   :  { %v4480_v7 = vadd.f32 %v4479_v56, %v4478_v53 }
 0x266   :  { %v3340_v40 = vadd.f32 %v4480_v7, %v3232_v36 }
 0x279   :  { %v4513_v30 = vpop.f32.mrb[22].mxu0 }
 0x27a   :  { %v4514_v2 = vpop.f32.mrb[23].mxu0 }
 0x27b   :  { %v4515_v35 = vadd.f32 %v4514_v2, %v4513_v30 }
 0x27d   :  { %v3508_v11 = vadd.f32 %v4515_v35, %v3340_v40 }
 0x282   :  { %v4548_v47 = vpop.f32.mrb[22].mxu1 }
 0x283   :  { %v4549_v48 = vpop.f32.mrb[23].mxu1 }
 0x284   :  { %v4550_v54 = vadd.f32 %v4549_v48, %v4548_v47 }
 0x286   :  { %v3612_v27 = vadd.f32 %v4550_v54, %v3508_v11 }
 0x288   :  { %v3622_v42 = vadd.f32 %v3710_v37, %v3612_v27 }
 0x28a   :  { %v3623_v5 = vmax.f32 %v3622_v42, 0.0 }
 0x28c   :  { %v3624_v25 = vmin.f32 %v3623_v5, 1000000.0 }
 0x28e   :  { %3631 = vrot.lane.b32.xlu0 %v3624_v25, %s5364_s19  ;;  %v3696_v50 = vsel %vm3695_vm0, %v3622_v42, %v3624_v25 }
 0x292   :  { %3627 = vrot.lane.b32.xlu0 %v3624_v25, %s5365_s20 }
 0x300   :  { %v3632_v14 = vpop.permute.xlu0 %3631 }
 0x301   :  { %v3634_v44 = vsub.f32 %v3625_v24, %v3632_v14 }
 0x303   :  { %3638 = vrot.lane.b32.xlu1 %v3634_v44, %s5366_s23  ;;  %v3635_v57 = vsub.f32 0.0, %v3634_v44 }
 0x304   :  { %v3628_v33 = vpop.permute.xlu0 %3627 }
 0x305   :  { %v3630_v13 = vsub.f32 %v3625_v24, %v3628_v33 }
 0x307   :  { %3648 = vrot.lane.b32.xlu0 %v3630_v13, %s5367_s2  ;;  %v3636_v52 = vsub.f32 0.0, %v3630_v13 }
 0x375   :  { %v3639_v62 = vpop.permute.xlu1 %3638 }
 0x376   :  { %v3641_v51 = vmin.f32 %v3636_v52, %v3639_v62 }
 0x378   :  { %3643 = vrot.lane.b32.xlu1 %v3641_v51, %s5367_s2 }
 0x379   :  { %v3649_v60 = vpop.permute.xlu0 %3648 }
 0x3ea   :  { %v3644_v15 = vpop.permute.xlu1 %3643 }
 0x3eb   :  { %v3646_v43 = vmax.f32 %v3635_v57, %v3644_v15 }
 0x3ed   :  { %v3651_v49 = vmax.f32 %v3646_v43, %v3649_v60 }
 0x3ef   :  { %v3652_v34 = vsub.f32 %v3635_v57, %v3651_v49  ;;  %3656 = vrot.lane.b32.xlu1 %v3651_v49, %s5366_s23 }
 0x3f1   :  { %v3653_v17 = vmul.f32 1.442695, %v3652_v34 }
 0x461   :  { %v3657_v12 = vpop.permute.xlu1 %3656 }
 0x462   :  { %v3659_v61 = vsub.f32 %v3641_v51, %v3657_v12  ;;  %v3662_v6 = vsub.f32 %v3630_v13, %v3657_v12 }
 0x464   :  { %v3660_v18 = vmul.f32 1.442695, %v3659_v61  ;;  %v3663_v22 = vmul.f32 1.442695, %v3662_v6 }
 0x466   :  { %5329 = vpow2.f32 %v3660_v18 }
 0x467   :  { %5331 = vpow2.f32 %v3663_v22 }
 0x468   :  { %5333 = vpow2.f32 %v3653_v17 }
 0x470   :  { %v5330_v59 = vpop.eup %5329 }
 0x471   :  { %v5332_v10 = vpop.eup %5331  ;;  %3666 = vrot.lane.b32.xlu0 %v5330_v59, %s5367_s2 }
 0x472   :  { %3671 = vrot.lane.b32.xlu1 %v5332_v10, %s5367_s2  ;;  %v5334_v1 = vpop.eup %5333 }
 0x4e3   :  { %v3667_v4 = vpop.permute.xlu0 %3666 }
 0x4e4   :  { %v3669_v45 = vadd.f32 %v5334_v1, %v3667_v4  ;;  %v3672_v8 = vpop.permute.xlu1 %3671 }
 0x4e6   :  { %v3674_v55 = vadd.f32 %v3672_v8, %v3669_v45 }
 0x4e8   :  { %5335 = vrcp.f32 %v3674_v55 }
 0x4f2   :  { %v5336_v58 = vpop.eup %5335 }
 0x4f3   :  { %3678 = vrot.lane.b32.xlu0 %v5336_v58, %s5366_s23  ;;  %v3676_v3 = vmul.f32 %v5336_v58, %v5334_v1 }
 0x4f5   :  { %3684 = vrot.lane.b32.xlu1 %v3676_v3, %s5368_s3 }
 0x565   :  { %v3679_v28 = vpop.permute.xlu0 %3678 }
 0x566   :  { %v3681_v63 = vmul.f32 %v5330_v59, %v3679_v28  ;;  %v3682_v21 = vmul.f32 %v5332_v10, %v3679_v28 }
 0x567   :  { %v3685_v16 = vpop.permute.xlu1 %3684 }
 0x568   :  { %3688 = vrot.lane.b32.xlu0 %v3681_v63, %s5369_s24  ;;  %3692 = vrot.lane.b32.xlu1 %v3682_v21, %s5370_s25  ;;  %v3698_v29 = vsel %vm3697_vm1, %v3696_v50, %v3685_v16 }
 0x5da   :  { %v3689_v19 = vpop.permute.xlu0 %3688  ;;  %v3693_v32 = vpop.permute.xlu1 %3692 }
 0x5db   :  { %v3700_v9 = vsel %vm3699_vm2, %v3698_v29, %v3689_v19 }
 0x5dc   :  { %v3702_v39 = vsel %vm3701_vm3, %v3700_v9, %v3693_v32 }
 0x5dd   :  { %3704 = vst.msk [vmem:[%s7272_s4] sm:$0xff] %vm3703_vm4, %v3702_v39 }
 0x5de   :  { %3709 = vsyncpa [#allocation3], 1 }

</bundles_post_ra>
